<compile_context>
chip_gen: v7x
topology: tpu7x:2x2x1
jax: 0.10.0
libtpu: 0.0.40
codegen_flags: <defaults>
</compile_context>

<pallas_src>
import functools
import itertools
import math

import jax
import jax.numpy as jnp
import numpy as np
from jax.experimental import pallas as pl
from jax.experimental.pallas import tpu as pltpu


_VMEM_LIMIT = 32 * 1024 * 1024  # safe scoped-VMEM budget on v5e / v6e / v7x


# ------------------------------ small helpers ------------------------------

def _gelu(x):
    # TODO(synk): reference uses exact (erf) GELU; tanh-approx is used in-kernel
    # (erf lowering in Mosaic is not guaranteed; difference is <1e-3 relative).
    c = math.sqrt(2.0 / math.pi)
    return 0.5 * x * (1.0 + jnp.tanh(c * (x + 0.044715 * x * x * x)))


def _pick_tile(dim, target):
    """Largest tile <= target that divides dim (prefer multiples of 128)."""
    if dim <= target:
        return dim
    start = target - (target % 128)
    for t in range(start, 0, -128):
        if t > 0 and dim % t == 0:
            return t
    for t in range(target, 0, -1):
        if dim % t == 0:
            return t
    return dim


# --------------------------- tiled matmul kernel ----------------------------
# y = x @ w + b  [+ residual] [-> gelu], K-accumulated in f32 VMEM scratch.

def _matmul_kernel(*refs, activation, has_residual):
    if has_residual:
        x_ref, w_ref, b_ref, r_ref, o_ref, acc_ref = refs
    else:
        x_ref, w_ref, b_ref, o_ref, acc_ref = refs
    k = pl.program_id(2)

    @pl.when(k == 0)
    def _():
        acc_ref[...] = jnp.zeros_like(acc_ref)

    acc_ref[...] += jnp.dot(x_ref[...], w_ref[...],
                            preferred_element_type=jnp.float32)

    @pl.when(k == pl.num_programs(2) - 1)
    def _():
        y = acc_ref[...] + b_ref[...].astype(jnp.float32)
        if has_residual:
            y = y + r_ref[...].astype(jnp.float32)
        if activation == "gelu":
            y = _gelu(y)
        o_ref[...] = y.astype(o_ref.dtype)


def matmul(x, w, b, residual=None, *, activation=None, out_dtype=None,
           tm=256, tn=512, tk=512):
    M, K = x.shape
    _, N = w.shape
    out_dtype = out_dtype or x.dtype
    tm = _pick_tile(M, tm)
    tn = _pick_tile(N, tn)
    tk = _pick_tile(K, tk)
    grid = (M // tm, N // tn, K // tk)
    in_specs = [
        pl.BlockSpec((tm, tk), lambda i, j, k: (i, k)),
        pl.BlockSpec((tk, tn), lambda i, j, k: (k, j)),
        pl.BlockSpec((1, tn), lambda i, j, k: (0, j)),
    ]
    args = [x, w, b]
    if residual is not None:
        in_specs.append(pl.BlockSpec((tm, tn), lambda i, j, k: (i, j)))
        args.append(residual)
    return pl.pallas_call(
        functools.partial(_matmul_kernel, activation=activation,
                          has_residual=residual is not None),
        grid=grid,
        in_specs=in_specs,
        out_specs=pl.BlockSpec((tm, tn), lambda i, j, k: (i, j)),
        out_shape=jax.ShapeDtypeStruct((M, N), out_dtype),
        scratch_shapes=[pltpu.VMEM((tm, tn), jnp.float32)],
        compiler_params=pltpu.CompilerParams(
            dimension_semantics=("parallel", "parallel", "arbitrary"),
            vmem_limit_bytes=_VMEM_LIMIT),
    )(*args)


# ----------------------- LayerNorm-prologue matmul kernel --------------------
# y = LN(x) @ w [+ b] [-> gelu]; full K per block (LN needs the whole row).

def _ln_matmul_kernel(*refs, eps, activation, has_bias):
    if has_bias:
        x_ref, g_ref, beta_ref, w_ref, b_ref, o_ref = refs
    else:
        x_ref, g_ref, beta_ref, w_ref, o_ref = refs
    x = x_ref[...].astype(jnp.float32)
    mu = jnp.mean(x, axis=-1, keepdims=True)
    var = jnp.mean(jnp.square(x - mu), axis=-1, keepdims=True)
    xn = (x - mu) * jax.lax.rsqrt(var + eps)
    xn = xn * g_ref[...].astype(jnp.float32) + beta_ref[...].astype(jnp.float32)
    y = jnp.dot(xn.astype(w_ref.dtype), w_ref[...],
                preferred_element_type=jnp.float32)
    if has_bias:
        y = y + b_ref[...].astype(jnp.float32)
    if activation == "gelu":
        y = _gelu(y)
    o_ref[...] = y.astype(o_ref.dtype)


def ln_matmul(x, g, beta, w, b=None, *, activation=None, out_dtype=None,
              eps=1e-5, tm=256, tn=512):
    M, K = x.shape
    _, N = w.shape
    out_dtype = out_dtype or x.dtype
    tm = _pick_tile(M, tm)
    tn = _pick_tile(N, tn)
    grid = (M // tm, N // tn)
    in_specs = [
        pl.BlockSpec((tm, K), lambda i, j: (i, 0)),
        pl.BlockSpec((1, K), lambda i, j: (0, 0)),
        pl.BlockSpec((1, K), lambda i, j: (0, 0)),
        pl.BlockSpec((K, tn), lambda i, j: (0, j)),
    ]
    args = [x, g, beta, w]
    if b is not None:
        in_specs.append(pl.BlockSpec((1, tn), lambda i, j: (0, j)))
        args.append(b)
    return pl.pallas_call(
        functools.partial(_ln_matmul_kernel, eps=eps, activation=activation,
                          has_bias=b is not None),
        grid=grid,
        in_specs=in_specs,
        out_specs=pl.BlockSpec((tm, tn), lambda i, j: (i, j)),
        out_shape=jax.ShapeDtypeStruct((M, N), out_dtype),
        compiler_params=pltpu.CompilerParams(
            dimension_semantics=("parallel", "parallel"),
            vmem_limit_bytes=_VMEM_LIMIT),
    )(*args)


# -------------------- fused attention block (per-batch grid) ----------------
# From lane-dense qkv (N, 3*D): per head QK^T*scale - slope_h*dist (alibi rebuilt
# in-kernel from the gathered distance matrix + static per-head slope), softmax,
# P@V; the head-merge + out-projection is folded into a sum over per-head
# row-blocks of Wo (no in-kernel concat/transpose), plus bias and residual add.

def _attn_block_kernel(qkv_ref, dist_ref, wo_ref, bo_ref, xres_ref, o_ref, *,
                       heads, dim_head, scale, slopes):
    d = heads * dim_head
    dist = dist_ref[...].astype(jnp.float32)                 # (N, N)
    y = xres_ref[...].astype(jnp.float32) + bo_ref[...].astype(jnp.float32)
    for h in range(heads):                                   # static unroll over heads
        lo = h * dim_head
        hi = lo + dim_head
        q = qkv_ref[:, lo:hi]                                # (N, Dh)  bf16 MXU operands
        k = qkv_ref[:, d + lo:d + hi]
        v = qkv_ref[:, 2 * d + lo:2 * d + hi]
        s = jax.lax.dot_general(q, k, (((1,), (1,)), ((), ())),
                                preferred_element_type=jnp.float32)
        s = s * scale - slopes[h] * dist                     # alibi rebuilt in-kernel
        s = s - jnp.max(s, axis=-1, keepdims=True)
        p = jnp.exp(s)
        p = p * pl.reciprocal(jnp.sum(p, axis=-1, keepdims=True), approx=True)
        o_h = jnp.dot(p.astype(v.dtype), v, preferred_element_type=jnp.float32)
        y = y + jnp.dot(o_h.astype(wo_ref.dtype), wo_ref[lo:hi, :],
                        preferred_element_type=jnp.float32)
    o_ref[...] = y.astype(o_ref.dtype)


def attention_block(x, qkv, dist, wo, bo, *, heads, slopes, out_dtype=None):
    # x: (B, N, D) residual; qkv: (B, N, 3D); dist: (B, N, N) f32; wo: (D, D); bo: (1, D)
    B, N, D3 = qkv.shape
    D = D3 // 3
    dim_head = D // heads
    scale = dim_head ** -0.5
    out_dtype = out_dtype or x.dtype
    # TODO(synk): at real sequence lengths (N ~ 1024) the query axis should also be
    # tiled; at these sizes one (N, D) tile per batch fits VMEM comfortably.
    return pl.pallas_call(
        functools.partial(_attn_block_kernel, heads=heads, dim_head=dim_head,
                          scale=scale, slopes=slopes),
        grid=(B,),
        in_specs=[
            pl.BlockSpec((None, N, D3), lambda b: (b, 0, 0)),
            pl.BlockSpec((None, N, N), lambda b: (b, 0, 0)),
            pl.BlockSpec((D, D), lambda b: (0, 0)),
            pl.BlockSpec((1, D), lambda b: (0, 0)),
            pl.BlockSpec((None, N, D), lambda b: (b, 0, 0)),
        ],
        out_specs=pl.BlockSpec((None, N, D), lambda b: (b, 0, 0)),
        out_shape=jax.ShapeDtypeStruct((B, N, D), out_dtype),
        compiler_params=pltpu.CompilerParams(
            dimension_semantics=("parallel",),
            vmem_limit_bytes=_VMEM_LIMIT),
    )(qkv, dist, wo, bo, x)


# ------- fused final LayerNorm + seq mean + GAP LayerNorm + FFN1 + GELU -------

def _ln_mean_gap_kernel(x_ref, ng_ref, nb_ref, gg_ref, gb_ref, w1_ref, b1_ref,
                        o_ref, *, eps, inv_n):
    x = x_ref[...].astype(jnp.float32)                       # (N, D)
    mu = jnp.mean(x, axis=-1, keepdims=True)
    var = jnp.mean(jnp.square(x - mu), axis=-1, keepdims=True)
    xn = (x - mu) * jax.lax.rsqrt(var + eps)
    xn = xn * ng_ref[...].astype(jnp.float32) + nb_ref[...].astype(jnp.float32)
    m = jnp.sum(xn, axis=0, keepdims=True) * inv_n           # (1, D) sequence mean
    mu2 = jnp.mean(m, axis=-1, keepdims=True)
    var2 = jnp.mean(jnp.square(m - mu2), axis=-1, keepdims=True)
    mn = (m - mu2) * jax.lax.rsqrt(var2 + eps)
    mn = mn * gg_ref[...].astype(jnp.float32) + gb_ref[...].astype(jnp.float32)
    y = jnp.dot(mn.astype(w1_ref.dtype), w1_ref[...],
                preferred_element_type=jnp.float32)
    y = _gelu(y + b1_ref[...].astype(jnp.float32))
    o_ref[...] = y.astype(o_ref.dtype)


def ln_mean_gap(x, ng, nb, gg, gb, w1, b1, *, eps=1e-5, out_dtype=None):
    B, N, D = x.shape
    D4 = w1.shape[1]
    out_dtype = out_dtype or x.dtype
    out = pl.pallas_call(
        functools.partial(_ln_mean_gap_kernel, eps=eps, inv_n=1.0 / N),
        grid=(B,),
        in_specs=[
            pl.BlockSpec((None, N, D), lambda b: (b, 0, 0)),
            pl.BlockSpec((1, D), lambda b: (0, 0)),
            pl.BlockSpec((1, D), lambda b: (0, 0)),
            pl.BlockSpec((1, D), lambda b: (0, 0)),
            pl.BlockSpec((1, D), lambda b: (0, 0)),
            pl.BlockSpec((D, D4), lambda b: (0, 0)),
            pl.BlockSpec((1, D4), lambda b: (0, 0)),
        ],
        out_specs=pl.BlockSpec((None, 1, D4), lambda b: (b, 0, 0)),
        out_shape=jax.ShapeDtypeStruct((B, 1, D4), out_dtype),
        compiler_params=pltpu.CompilerParams(
            dimension_semantics=("parallel",),
            vmem_limit_bytes=_VMEM_LIMIT),
    )(x, ng, nb, gg, gb, w1, b1)
    return out.reshape(B, D4)


# --------------------------- plain-JAX / setup glue --------------------------

def get_slopes(n):
    def power2(n):
        start = 2 ** (-2 ** (-(math.log2(n) - 3)))
        ratio = start
        return [start * ratio ** i for i in range(n)]
    if math.log2(n).is_integer():
        return power2(n)
    closest = 2 ** math.floor(math.log2(n))
    return power2(closest) + get_slopes(2 * closest)[0::2][: n - closest]


def get_patch_distances(num_patches):
    """(P, P) Euclidean distance matrix between patch grid positions.
    Equivalent to the reference's get_alibi with the per-head slope factored out
    (alibi[h] = -slope[h] * dist)."""
    side = int(math.sqrt(num_patches))
    pts = np.array(list(itertools.product(range(side), range(side))),
                   dtype=np.float32)                                  # (P, 2)
    diff = pts[:, None, :] - pts[None, :, :]
    return np.sqrt((diff ** 2).sum(-1)).astype(np.float32)           # (P, P)


def gather_masked_dist(dist_full, ids_keep):
    """Exact reproduction of the reference's torch.gather-based alibi masking,
    applied to the slope-factored distance matrix (glue, runs once per forward).
    dist is symmetric so the reference's (row=ids_k, col=ids_q) gather is
    numerically identical to this (ids_q, ids_k) gather."""
    return dist_full[ids_keep[:, :, None], ids_keep[:, None, :]]     # (B, L, L)


def init_params(key, *, pixels_per_patch, dim, layers, w_dtype=jnp.bfloat16):
    keys = iter(jax.random.split(key, 64))

    def w(shape, scale=0.02):
        return (scale * jax.random.normal(next(keys), shape, jnp.float32)).astype(w_dtype)

    def b(shape, scale=0.02):
        return scale * jax.random.normal(next(keys), shape, jnp.float32)

    params = {
        "linear_input_w": w((pixels_per_patch, dim)),
        "linear_input_b": b((1, dim)),
        "layers": [],
        "norm_out_g": jnp.ones((1, dim), jnp.float32),
        "norm_out_b": jnp.zeros((1, dim), jnp.float32),
        "gap_ln_g": jnp.ones((1, dim), jnp.float32),
        "gap_ln_b": jnp.zeros((1, dim), jnp.float32),
        "gap_w1": w((dim, 4 * dim)), "gap_b1": b((1, 4 * dim)),
        "gap_w2": w((4 * dim, dim)), "gap_b2": b((1, dim)),
    }
    for _ in range(layers):
        params["layers"].append({
            "attn_ln_g": jnp.ones((1, dim), jnp.float32),
            "attn_ln_b": jnp.zeros((1, dim), jnp.float32),
            "qkv_w": w((dim, 3 * dim)),                       # create_qkv: bias=False
            "out_w": w((dim, dim)), "out_b": b((1, dim)),
            "ffn_ln_g": jnp.ones((1, dim), jnp.float32),
            "ffn_ln_b": jnp.zeros((1, dim), jnp.float32),
            "ffn_w1": w((dim, 4 * dim)), "ffn_b1": b((1, 4 * dim)),
            "ffn_w2": w((4 * dim, dim)), "ffn_b2": b((1, dim)),
        })
    return params


# ------------------------------- forward pass --------------------------------

def croma_forward(params, dist_full, imgs, ids_keep, len_keep, *,
                  patch_size, heads, compute_dtype=jnp.bfloat16):
    B, C, Himg, Wimg = imgs.shape
    dim = params["linear_input_w"].shape[1]
    hh, ww = Himg // patch_size, Wimg // patch_size
    num_patches = hh * ww
    N = num_patches

    # Per-head alibi slopes: static Python floats, baked into the attention kernel.
    slopes = tuple(float(s) for s in get_slopes(heads))

    # Masked distance matrix: built once per forward (H-x smaller than the full
    # (B, H, N, N) bias of the reference; per-head bias rebuilt in-kernel).
    dist = gather_masked_dist(dist_full, ids_keep)           # (B, len_keep, len_keep)
    # Matches the reference's alibi[:, :, :N, :N] slice; as in PyTorch, shapes only
    # line up when len_keep == num_patches (the ViT runs on the full sequence).
    dist = dist[:, :N, :N].astype(jnp.float32)

    # patchify 'b c (h i) (w j) -> b (h w) (c i j)'  (plain-JAX glue)
    x = imgs.reshape(B, C, hh, patch_size, ww, patch_size)
    x = x.transpose(0, 2, 4, 1, 3, 5).reshape(B * N, C * patch_size * patch_size)
    x = x.astype(compute_dtype)

    # ViT linear input
    x = matmul(x, params["linear_input_w"], params["linear_input_b"],
               out_dtype=compute_dtype)                                  # (B*N, dim)

    for lp in params["layers"]:
        # --- self-attention block: (LN -> QKV) fused, (attn + out-proj + residual) fused
        qkv = ln_matmul(x, lp["attn_ln_g"], lp["attn_ln_b"],
                        lp["qkv_w"], out_dtype=compute_dtype)
        x = attention_block(x.reshape(B, N, dim), qkv.reshape(B, N, 3 * dim),
                            dist, lp["out_w"], lp["out_b"], heads=heads,
                            slopes=slopes,
                            out_dtype=compute_dtype).reshape(B * N, dim)

        # --- FFN block: (LN -> W1 -> GELU) fused, (W2 + bias + residual) fused
        h = ln_matmul(x, lp["ffn_ln_g"], lp["ffn_ln_b"],
                      lp["ffn_w1"], lp["ffn_b1"], activation="gelu",
                      out_dtype=compute_dtype)
        x = matmul(h, lp["ffn_w2"], lp["ffn_b2"], residual=x,
                   out_dtype=compute_dtype)

    # final LayerNorm + mean over sequence + GAP (LN -> Linear -> GELU), fused
    g = ln_mean_gap(x.reshape(B, N, dim), params["norm_out_g"],
                    params["norm_out_b"], params["gap_ln_g"], params["gap_ln_b"],
                    params["gap_w1"], params["gap_b1"],
                    out_dtype=compute_dtype)                             # (B, 4*dim)

    # GAP head final Linear (f32 output)
    g = matmul(g, params["gap_w2"], params["gap_b2"], out_dtype=jnp.float32)
    return g                                                             # radar_GAP


# ----------------------------------- main ------------------------------------

if __name__ == "__main__":
    # Small, consistent shapes: 16x16 NCHW images, 4x4 patches -> 16 patches.
    patch_size = 4
    encoder_dim = 64
    encoder_layers = 4          # ViT uses encoder_layers // 2 layers
    attention_heads = 4
    total_channels = 3
    num_patches = 16
    img_side = int(math.sqrt(num_patches)) * patch_size
    B = 2

    key = jax.random.PRNGKey(0)
    k_img, k_param, k_perm = jax.random.split(key, 3)

    imgs = jax.random.normal(k_img, (B, total_channels, img_side, img_side),
                             jnp.float32)

    # radar_mask_info: keep all patches (len_keep == num_patches) in a permuted
    # order — required for shape consistency in the reference forward, which runs
    # the ViT on the full (unmasked) sequence but adds the gathered alibi.
    perm_keys = jax.random.split(k_perm, B)
    ids_keep = jnp.stack(
        [jax.random.permutation(pk, num_patches) for pk in perm_keys]
    ).astype(jnp.int32)
    len_keep = num_patches

    pixels_per_patch = patch_size * patch_size * total_channels
    params = init_params(k_param, pixels_per_patch=pixels_per_patch,
                         dim=encoder_dim, layers=encoder_layers // 2)
    dist_full = jnp.asarray(get_patch_distances(num_patches), jnp.float32)

    fwd = jax.jit(
        functools.partial(croma_forward, patch_size=patch_size,
                          heads=attention_heads),
        static_argnums=(4,))   # len_keep is a static shape parameter

    out = fwd(params, dist_full, imgs, ids_keep, len_keep)
    out = jax.block_until_ready(out)
    assert out.shape == (B, encoder_dim) and out.dtype == jnp.float32
    assert bool(jnp.all(jnp.isfinite(out)))
    print("KERNEL_OK")
</pallas_src>

<mosaic_0001>
module attributes {stable_mosaic.version = 11 : i64} {
  func.func @_ln_matmul_kernel(%arg0: i32, %arg1: i32, %arg2: memref<32x64xbf16, #tpu.memory_space<vmem>>, %arg3: memref<1x64xf32, #tpu.memory_space<vmem>>, %arg4: memref<1x64xf32, #tpu.memory_space<vmem>>, %arg5: memref<64x192xbf16, #tpu.memory_space<vmem>>, %arg6: memref<32x192xbf16, #tpu.memory_space<vmem>>) attributes {dimension_semantics = [#tpu.dimension_semantics<parallel>, #tpu.dimension_semantics<parallel>], iteration_bounds = array<i64: 1, 1>, scalar_prefetch = 0 : i64, scratch_operands = 0 : i64, tpu.core_type = #tpu.core_type<tc>, window_params = [{transform_indices = @transform_0, window_bounds = array<i64: 32, 64>}, {pipeline_mode = #tpu.pipeline_mode<synchronous>, transform_indices = @transform_1, window_bounds = array<i64: 1, 64>}, {pipeline_mode = #tpu.pipeline_mode<synchronous>, transform_indices = @transform_2, window_bounds = array<i64: 1, 64>}, {transform_indices = @transform_3, window_bounds = array<i64: 64, 192>}, {transform_indices = @transform_4, window_bounds = array<i64: 32, 192>}]} {
    %c0 = arith.constant 0 : index
    %c0_0 = arith.constant 0 : index
    %0 = vector.load %arg2[%c0, %c0_0] : memref<32x64xbf16, #tpu.memory_space<vmem>>, vector<32x64xbf16>
    %1 = arith.extf %0 : vector<32x64xbf16> to vector<32x64xf32>
    %cst = arith.constant dense<0.000000e+00> : vector<32xf32>
    %2 = vector.multi_reduction <add>, %1, %cst [1] : vector<32x64xf32> to vector<32xf32>
    %3 = vector.shape_cast %2 : vector<32xf32> to vector<32x1xf32>
    %cst_1 = arith.constant 6.400000e+01 : f32
    %4 = vector.broadcast %cst_1 : f32 to vector<32x1xf32>
    %5 = arith.divf %3, %4 : vector<32x1xf32>
    %6 = vector.broadcast %5 : vector<32x1xf32> to vector<32x64xf32>
    %7 = arith.subf %1, %6 : vector<32x64xf32>
    %8 = arith.mulf %7, %7 : vector<32x64xf32>
    %cst_2 = arith.constant dense<0.000000e+00> : vector<32xf32>
    %9 = vector.multi_reduction <add>, %8, %cst_2 [1] : vector<32x64xf32> to vector<32xf32>
    %10 = vector.shape_cast %9 : vector<32xf32> to vector<32x1xf32>
    %cst_3 = arith.constant 6.400000e+01 : f32
    %11 = vector.broadcast %cst_3 : f32 to vector<32x1xf32>
    %12 = arith.divf %10, %11 : vector<32x1xf32>
    %13 = vector.broadcast %5 : vector<32x1xf32> to vector<32x64xf32>
    %14 = arith.subf %1, %13 : vector<32x64xf32>
    %cst_4 = arith.constant 9.99999974E-6 : f32
    %15 = vector.broadcast %cst_4 : f32 to vector<32x1xf32>
    %16 = arith.addf %12, %15 : vector<32x1xf32>
    %17 = math.rsqrt %16 : vector<32x1xf32>
    %18 = vector.broadcast %17 : vector<32x1xf32> to vector<32x64xf32>
    %19 = arith.mulf %14, %18 : vector<32x64xf32>
    %c0_5 = arith.constant 0 : index
    %c0_6 = arith.constant 0 : index
    %20 = vector.load %arg3[%c0_5, %c0_6] : memref<1x64xf32, #tpu.memory_space<vmem>>, vector<1x64xf32>
    %21 = vector.broadcast %20 : vector<1x64xf32> to vector<32x64xf32>
    %22 = arith.mulf %19, %21 : vector<32x64xf32>
    %c0_7 = arith.constant 0 : index
    %c0_8 = arith.constant 0 : index
    %23 = vector.load %arg4[%c0_7, %c0_8] : memref<1x64xf32, #tpu.memory_space<vmem>>, vector<1x64xf32>
    %24 = vector.broadcast %23 : vector<1x64xf32> to vector<32x64xf32>
    %25 = arith.addf %22, %24 : vector<32x64xf32>
    %26 = arith.truncf %25 : vector<32x64xf32> to vector<32x64xbf16>
    %c0_9 = arith.constant 0 : index
    %c0_10 = arith.constant 0 : index
    %27 = vector.load %arg5[%c0_9, %c0_10] : memref<64x192xbf16, #tpu.memory_space<vmem>>, vector<64x192xbf16>
    %cst_11 = arith.constant dense<0.000000e+00> : vector<32x192xf32>
    %28 = tpu.matmul %26, %27, %cst_11 {dimension_numbers = #tpu.dot_dimension_numbers<[1], [0], [0], [1], [0, 0, 1, 1], [], []>} : vector<32x64xbf16>, vector<64x192xbf16>, vector<32x192xf32> -> vector<32x192xf32>
    %29 = arith.truncf %28 : vector<32x192xf32> to vector<32x192xbf16>
    %c0_12 = arith.constant 0 : index
    %c0_13 = arith.constant 0 : index
    %30 = vector.load %arg6[%c0_12, %c0_13] : memref<32x192xbf16, #tpu.memory_space<vmem>>, vector<32x192xbf16>
    tpu.vector_store %arg6[%c0_12, %c0_13], %29 {strides = array<i32>} : memref<32x192xbf16, #tpu.memory_space<vmem>>, vector<32x192xbf16>,
    return
  }
  func.func @transform_0(%arg0: i32, %arg1: i32) -> (i32, i32) {
    %c0_i32 = arith.constant 0 : i32
    %c0_i32_0 = arith.constant 0 : i32
    return %arg0, %c0_i32 : i32, i32
  }
  func.func @transform_1(%arg0: i32, %arg1: i32) -> (i32, i32) {
    %c0_i32 = arith.constant 0 : i32
    %c0_i32_0 = arith.constant 0 : i32
    %c0_i32_1 = arith.constant 0 : i32
    return %c0_i32, %c0_i32_0 : i32, i32
  }
  func.func @transform_2(%arg0: i32, %arg1: i32) -> (i32, i32) {
    %c0_i32 = arith.constant 0 : i32
    %c0_i32_0 = arith.constant 0 : i32
    %c0_i32_1 = arith.constant 0 : i32
    return %c0_i32, %c0_i32_0 : i32, i32
  }
  func.func @transform_3(%arg0: i32, %arg1: i32) -> (i32, i32) {
    %c0_i32 = arith.constant 0 : i32
    %c0_i32_0 = arith.constant 0 : i32
    return %c0_i32, %arg1 : i32, i32
  }
  func.func @transform_4(%arg0: i32, %arg1: i32) -> (i32, i32) {
    %c0_i32 = arith.constant 0 : i32
    return %arg0, %arg1 : i32, i32
  }
}

module attributes {stable_mosaic.version = 11 : i64} {
  func.func @_matmul_kernel(%arg0: i32, %arg1: i32, %arg2: i32, %arg3: memref<32x48xbf16, #tpu.memory_space<vmem>>, %arg4: memref<48x64xbf16, #tpu.memory_space<vmem>>, %arg5: memref<1x64xf32, #tpu.memory_space<vmem>>, %arg6: memref<32x64xbf16, #tpu.memory_space<vmem>>, %arg7: memref<32x64xf32, #tpu.memory_space<vmem>>) attributes {dimension_semantics = [#tpu.dimension_semantics<parallel>, #tpu.dimension_semantics<parallel>, #tpu.dimension_semantics<arbitrary>], iteration_bounds = array<i64: 1, 1, 1>, scalar_prefetch = 0 : i64, scratch_operands = 1 : i64, tpu.core_type = #tpu.core_type<tc>, window_params = [{transform_indices = @transform_0, window_bounds = array<i64: 32, 48>}, {transform_indices = @transform_1, window_bounds = array<i64: 48, 64>}, {transform_indices = @transform_2, window_bounds = array<i64: 1, 64>}, {transform_indices = @transform_3, window_bounds = array<i64: 32, 64>}]} {
    %c0_i32 = arith.constant 0 : i32
    %0 = arith.cmpi eq, %arg2, %c0_i32 : i32
    %1 = arith.extui %0 : i1 to i32
    %c0_i32_0 = arith.constant 0 : i32
    %2 = arith.cmpi ne, %1, %c0_i32_0 : i32
    scf.if %2 {
      %cst_10 = arith.constant 0.000000e+00 : f32
      %12 = vector.broadcast %cst_10 : f32 to vector<32x64xf32>
      %c0_11 = arith.constant 0 : index
      %c0_12 = arith.constant 0 : index
      %13 = vector.load %arg7[%c0_11, %c0_12] : memref<32x64xf32, #tpu.memory_space<vmem>>, vector<32x64xf32>
      tpu.vector_store %arg7[%c0_11, %c0_12], %12 {strides = array<i32>} : memref<32x64xf32, #tpu.memory_space<vmem>>, vector<32x64xf32>,
    } else {
    }
    %c0 = arith.constant 0 : index
    %c0_1 = arith.constant 0 : index
    %3 = vector.load %arg7[%c0, %c0_1] : memref<32x64xf32, #tpu.memory_space<vmem>>, vector<32x64xf32>
    %c0_2 = arith.constant 0 : index
    %c0_3 = arith.constant 0 : index
    %4 = vector.load %arg3[%c0_2, %c0_3] : memref<32x48xbf16, #tpu.memory_space<vmem>>, vector<32x48xbf16>
    %c0_4 = arith.constant 0 : index
    %c0_5 = arith.constant 0 : index
    %5 = vector.load %arg4[%c0_4, %c0_5] : memref<48x64xbf16, #tpu.memory_space<vmem>>, vector<48x64xbf16>
    %cst = arith.constant dense<0.000000e+00> : vector<32x64xf32>
    %6 = tpu.matmul %4, %5, %cst {dimension_numbers = #tpu.dot_dimension_numbers<[1], [0], [0], [1], [0, 0, 1, 1], [], []>} : vector<32x48xbf16>, vector<48x64xbf16>, vector<32x64xf32> -> vector<32x64xf32>
    %7 = arith.addf %3, %6 : vector<32x64xf32>
    %c0_6 = arith.constant 0 : index
    %c0_7 = arith.constant 0 : index
    %8 = vector.load %arg7[%c0_6, %c0_7] : memref<32x64xf32, #tpu.memory_space<vmem>>, vector<32x64xf32>
    tpu.vector_store %arg7[%c0_6, %c0_7], %7 {strides = array<i32>} : memref<32x64xf32, #tpu.memory_space<vmem>>, vector<32x64xf32>,
    %c0_i32_8 = arith.constant 0 : i32
    %9 = arith.cmpi eq, %arg2, %c0_i32_8 : i32
    %10 = arith.extui %9 : i1 to i32
    %c0_i32_9 = arith.constant 0 : i32
    %11 = arith.cmpi ne, %10, %c0_i32_9 : i32
    scf.if %11 {
      %c0_10 = arith.constant 0 : index
      %c0_11 = arith.constant 0 : index
      %12 = vector.load %arg7[%c0_10, %c0_11] : memref<32x64xf32, #tpu.memory_space<vmem>>, vector<32x64xf32>
      %c0_12 = arith.constant 0 : index
      %c0_13 = arith.constant 0 : index
      %13 = vector.load %arg5[%c0_12, %c0_13] : memref<1x64xf32, #tpu.memory_space<vmem>>, vector<1x64xf32>
      %14 = vector.broadcast %13 : vector<1x64xf32> to vector<32x64xf32>
      %15 = arith.addf %12, %14 : vector<32x64xf32>
      %16 = arith.truncf %15 : vector<32x64xf32> to vector<32x64xbf16>
      %c0_14 = arith.constant 0 : index
      %c0_15 = arith.constant 0 : index
      %17 = vector.load %arg6[%c0_14, %c0_15] : memref<32x64xbf16, #tpu.memory_space<vmem>>, vector<32x64xbf16>
      tpu.vector_store %arg6[%c0_14, %c0_15], %16 {strides = array<i32>} : memref<32x64xbf16, #tpu.memory_space<vmem>>, vector<32x64xbf16>,
    } else {
    }
    return
  }
  func.func @transform_0(%arg0: i32, %arg1: i32, %arg2: i32) -> (i32, i32) {
    %c0_i32 = arith.constant 0 : i32
    return %arg0, %arg2 : i32, i32
  }
  func.func @transform_1(%arg0: i32, %arg1: i32, %arg2: i32) -> (i32, i32) {
    %c0_i32 = arith.constant 0 : i32
    return %arg2, %arg1 : i32, i32
  }
  func.func @transform_2(%arg0: i32, %arg1: i32, %arg2: i32) -> (i32, i32) {
    %c0_i32 = arith.constant 0 : i32
    %c0_i32_0 = arith.constant 0 : i32
    return %c0_i32, %arg1 : i32, i32
  }
  func.func @transform_3(%arg0: i32, %arg1: i32, %arg2: i32) -> (i32, i32) {
    %c0_i32 = arith.constant 0 : i32
    return %arg0, %arg1 : i32, i32
  }
}

module attributes {stable_mosaic.version = 11 : i64} {
  func.func @_attn_block_kernel(%arg0: i32, %arg1: memref<1x16x192xbf16, #tpu.memory_space<vmem>>, %arg2: memref<1x16x16xf32, #tpu.memory_space<vmem>>, %arg3: memref<64x64xbf16, #tpu.memory_space<vmem>>, %arg4: memref<1x64xf32, #tpu.memory_space<vmem>>, %arg5: memref<1x16x64xbf16, #tpu.memory_space<vmem>>, %arg6: memref<1x16x64xbf16, #tpu.memory_space<vmem>>) attributes {dimension_semantics = [#tpu.dimension_semantics<parallel>], iteration_bounds = array<i64: 2>, scalar_prefetch = 0 : i64, scratch_operands = 0 : i64, tpu.core_type = #tpu.core_type<tc>, window_params = [{transform_indices = @transform_0, window_bounds = array<i64: 1, 16, 192>}, {transform_indices = @transform_1, window_bounds = array<i64: 1, 16, 16>}, {pipeline_mode = #tpu.pipeline_mode<synchronous>, transform_indices = @transform_2, window_bounds = array<i64: 64, 64>}, {pipeline_mode = #tpu.pipeline_mode<synchronous>, transform_indices = @transform_3, window_bounds = array<i64: 1, 64>}, {transform_indices = @transform_4, window_bounds = array<i64: 1, 16, 64>}, {transform_indices = @transform_5, window_bounds = array<i64: 1, 16, 64>}]} {
    %c0 = arith.constant 0 : index
    %c0_0 = arith.constant 0 : index
    %c0_1 = arith.constant 0 : index
    %0 = vector.load %arg2[%c0, %c0_0, %c0_1] : memref<1x16x16xf32, #tpu.memory_space<vmem>>, vector<1x16x16xf32>
    %1 = vector.shape_cast %0 : vector<1x16x16xf32> to vector<16x16xf32>
    %c0_2 = arith.constant 0 : index
    %c0_3 = arith.constant 0 : index
    %c0_4 = arith.constant 0 : index
    %2 = vector.load %arg5[%c0_2, %c0_3, %c0_4] : memref<1x16x64xbf16, #tpu.memory_space<vmem>>, vector<1x16x64xbf16>
    %3 = vector.shape_cast %2 : vector<1x16x64xbf16> to vector<16x64xbf16>
    %4 = arith.extf %3 : vector<16x64xbf16> to vector<16x64xf32>
    %c0_5 = arith.constant 0 : index
    %c0_6 = arith.constant 0 : index
    %5 = vector.load %arg4[%c0_5, %c0_6] : memref<1x64xf32, #tpu.memory_space<vmem>>, vector<1x64xf32>
    %6 = vector.broadcast %5 : vector<1x64xf32> to vector<16x64xf32>
    %7 = arith.addf %4, %6 : vector<16x64xf32>
    %c0_7 = arith.constant 0 : index
    %c0_8 = arith.constant 0 : index
    %c0_9 = arith.constant 0 : index
    %8 = vector.load %arg1[%c0_7, %c0_8, %c0_9] : memref<1x16x192xbf16, #tpu.memory_space<vmem>>, vector<1x16x16xbf16>
    %9 = vector.shape_cast %8 : vector<1x16x16xbf16> to vector<16x16xbf16>
    %c0_10 = arith.constant 0 : index
    %c0_11 = arith.constant 0 : index
    %c64 = arith.constant 64 : index
    %10 = vector.load %arg1[%c0_10, %c0_11, %c64] : memref<1x16x192xbf16, #tpu.memory_space<vmem>>, vector<1x16x16xbf16>
    %11 = vector.shape_cast %10 : vector<1x16x16xbf16> to vector<16x16xbf16>
    %c0_12 = arith.constant 0 : index
    %c0_13 = arith.constant 0 : index
    %c128 = arith.constant 128 : index
    %12 = vector.load %arg1[%c0_12, %c0_13, %c128] : memref<1x16x192xbf16, #tpu.memory_space<vmem>>, vector<1x16x16xbf16>
    %13 = vector.shape_cast %12 : vector<1x16x16xbf16> to vector<16x16xbf16>
    %cst = arith.constant dense<0.000000e+00> : vector<16x16xf32>
    %14 = tpu.matmul %9, %11, %cst {dimension_numbers = #tpu.dot_dimension_numbers<[1], [1], [0], [0], [0, 0, 1, 0], [], []>} : vector<16x16xbf16>, vector<16x16xbf16>, vector<16x16xf32> -> vector<16x16xf32>
    %cst_14 = arith.constant 2.500000e-01 : f32
    %15 = vector.broadcast %cst_14 : f32 to vector<16x16xf32>
    %16 = arith.mulf %14, %15 : vector<16x16xf32>
    %cst_15 = arith.constant 2.500000e-01 : f32
    %17 = vector.broadcast %cst_15 : f32 to vector<16x16xf32>
    %18 = arith.mulf %17, %1 : vector<16x16xf32>
    %19 = arith.subf %16, %18 : vector<16x16xf32>
    %cst_16 = arith.constant dense<0xFF800000> : vector<16xf32>
    %20 = vector.multi_reduction <maximumf>, %19, %cst_16 [1] : vector<16x16xf32> to vector<16xf32>
    %21 = vector.shape_cast %20 : vector<16xf32> to vector<16x1xf32>
    %22 = vector.broadcast %21 : vector<16x1xf32> to vector<16x16xf32>
    %23 = arith.subf %19, %22 : vector<16x16xf32>
    %24 = math.exp %23 : vector<16x16xf32>
    %cst_17 = arith.constant dense<0.000000e+00> : vector<16xf32>
    %25 = vector.multi_reduction <add>, %24, %cst_17 [1] : vector<16x16xf32> to vector<16xf32>
    %26 = vector.shape_cast %25 : vector<16xf32> to vector<16x1xf32>
    %27 = tpu.reciprocal %26 {approx = true} : vector<16x1xf32> -> vector<16x1xf32>
    %28 = vector.broadcast %27 : vector<16x1xf32> to vector<16x16xf32>
    %29 = arith.mulf %24, %28 : vector<16x16xf32>
    %30 = arith.truncf %29 : vector<16x16xf32> to vector<16x16xbf16>
    %cst_18 = arith.constant dense<0.000000e+00> : vector<16x16xf32>
    %31 = tpu.matmul %30, %13, %cst_18 {dimension_numbers = #tpu.dot_dimension_numbers<[1], [0], [0], [1], [0, 0, 1, 1], [], []>} : vector<16x16xbf16>, vector<16x16xbf16>, vector<16x16xf32> -> vector<16x16xf32>
    %32 = arith.truncf %31 : vector<16x16xf32> to vector<16x16xbf16>
    %c0_19 = arith.constant 0 : index
    %c0_20 = arith.constant 0 : index
    %33 = vector.load %arg3[%c0_19, %c0_20] : memref<64x64xbf16, #tpu.memory_space<vmem>>, vector<16x64xbf16>
    %cst_21 = arith.constant dense<0.000000e+00> : vector<16x64xf32>
    %34 = tpu.matmul %32, %33, %cst_21 {dimension_numbers = #tpu.dot_dimension_numbers<[1], [0], [0], [1], [0, 0, 1, 1], [], []>} : vector<16x16xbf16>, vector<16x64xbf16>, vector<16x64xf32> -> vector<16x64xf32>
    %35 = arith.addf %7, %34 : vector<16x64xf32>
    %c0_22 = arith.constant 0 : index
    %c0_23 = arith.constant 0 : index
    %c16 = arith.constant 16 : index
    %36 = vector.load %arg1[%c0_22, %c0_23, %c16] : memref<1x16x192xbf16, #tpu.memory_space<vmem>>, vector<1x16x16xbf16>
    %37 = vector.shape_cast %36 : vector<1x16x16xbf16> to vector<16x16xbf16>
    %c0_24 = arith.constant 0 : index
    %c0_25 = arith.constant 0 : index
    %c80 = arith.constant 80 : index
    %38 = vector.load %arg1[%c0_24, %c0_25, %c80] : memref<1x16x192xbf16, #tpu.memory_space<vmem>>, vector<1x16x16xbf16>
    %39 = vector.shape_cast %38 : vector<1x16x16xbf16> to vector<16x16xbf16>
    %c0_26 = arith.constant 0 : index
    %c0_27 = arith.constant 0 : index
    %c144 = arith.constant 144 : index
    %40 = vector.load %arg1[%c0_26, %c0_27, %c144] : memref<1x16x192xbf16, #tpu.memory_space<vmem>>, vector<1x16x16xbf16>
    %41 = vector.shape_cast %40 : vector<1x16x16xbf16> to vector<16x16xbf16>
    %cst_28 = arith.constant dense<0.000000e+00> : vector<16x16xf32>
    %42 = tpu.matmul %37, %39, %cst_28 {dimension_numbers = #tpu.dot_dimension_numbers<[1], [1], [0], [0], [0, 0, 1, 0], [], []>} : vector<16x16xbf16>, vector<16x16xbf16>, vector<16x16xf32> -> vector<16x16xf32>
    %cst_29 = arith.constant 2.500000e-01 : f32
    %43 = vector.broadcast %cst_29 : f32 to vector<16x16xf32>
    %44 = arith.mulf %42, %43 : vector<16x16xf32>
    %cst_30 = arith.constant 6.250000e-02 : f32
    %45 = vector.broadcast %cst_30 : f32 to vector<16x16xf32>
    %46 = arith.mulf %45, %1 : vector<16x16xf32>
    %47 = arith.subf %44, %46 : vector<16x16xf32>
    %cst_31 = arith.constant dense<0xFF800000> : vector<16xf32>
    %48 = vector.multi_reduction <maximumf>, %47, %cst_31 [1] : vector<16x16xf32> to vector<16xf32>
    %49 = vector.shape_cast %48 : vector<16xf32> to vector<16x1xf32>
    %50 = vector.broadcast %49 : vector<16x1xf32> to vector<16x16xf32>
    %51 = arith.subf %47, %50 : vector<16x16xf32>
    %52 = math.exp %51 : vector<16x16xf32>
    %cst_32 = arith.constant dense<0.000000e+00> : vector<16xf32>
    %53 = vector.multi_reduction <add>, %52, %cst_32 [1] : vector<16x16xf32> to vector<16xf32>
    %54 = vector.shape_cast %53 : vector<16xf32> to vector<16x1xf32>
    %55 = tpu.reciprocal %54 {approx = true} : vector<16x1xf32> -> vector<16x1xf32>
    %56 = vector.broadcast %55 : vector<16x1xf32> to vector<16x16xf32>
    %57 = arith.mulf %52, %56 : vector<16x16xf32>
    %58 = arith.truncf %57 : vector<16x16xf32> to vector<16x16xbf16>
    %cst_33 = arith.constant dense<0.000000e+00> : vector<16x16xf32>
    %59 = tpu.matmul %58, %41, %cst_33 {dimension_numbers = #tpu.dot_dimension_numbers<[1], [0], [0], [1], [0, 0, 1, 1], [], []>} : vector<16x16xbf16>, vector<16x16xbf16>, vector<16x16xf32> -> vector<16x16xf32>
    %60 = arith.truncf %59 : vector<16x16xf32> to vector<16x16xbf16>
    %c16_34 = arith.constant 16 : index
    %c0_35 = arith.constant 0 : index
    %61 = vector.load %arg3[%c16_34, %c0_35] : memref<64x64xbf16, #tpu.memory_space<vmem>>, vector<16x64xbf16>
    %cst_36 = arith.constant dense<0.000000e+00> : vector<16x64xf32>
    %62 = tpu.matmul %60, %61, %cst_36 {dimension_numbers = #tpu.dot_dimension_numbers<[1], [0], [0], [1], [0, 0, 1, 1], [], []>} : vector<16x16xbf16>, vector<16x64xbf16>, vector<16x64xf32> -> vector<16x64xf32>
    %63 = arith.addf %35, %62 : vector<16x64xf32>
    %c0_37 = arith.constant 0 : index
    %c0_38 = arith.constant 0 : index
    %c32 = arith.constant 32 : index
    %64 = vector.load %arg1[%c0_37, %c0_38, %c32] : memref<1x16x192xbf16, #tpu.memory_space<vmem>>, vector<1x16x16xbf16>
    %65 = vector.shape_cast %64 : vector<1x16x16xbf16> to vector<16x16xbf16>
    %c0_39 = arith.constant 0 : index
    %c0_40 = arith.constant 0 : index
    %c96 = arith.constant 96 : index
    %66 = vector.load %arg1[%c0_39, %c0_40, %c96] : memref<1x16x192xbf16, #tpu.memory_space<vmem>>, vector<1x16x16xbf16>
    %67 = vector.shape_cast %66 : vector<1x16x16xbf16> to vector<16x16xbf16>
    %c0_41 = arith.constant 0 : index
    %c0_42 = arith.constant 0 : index
    %c160 = arith.constant 160 : index
    %68 = vector.load %arg1[%c0_41, %c0_42, %c160] : memref<1x16x192xbf16, #tpu.memory_space<vmem>>, vector<1x16x16xbf16>
    %69 = vector.shape_cast %68 : vector<1x16x16xbf16> to vector<16x16xbf16>
    %cst_43 = arith.constant dense<0.000000e+00> : vector<16x16xf32>
    %70 = tpu.matmul %65, %67, %cst_43 {dimension_numbers = #tpu.dot_dimension_numbers<[1], [1], [0], [0], [0, 0, 1, 0], [], []>} : vector<16x16xbf16>, vector<16x16xbf16>, vector<16x16xf32> -> vector<16x16xf32>
    %cst_44 = arith.constant 2.500000e-01 : f32
    %71 = vector.broadcast %cst_44 : f32 to vector<16x16xf32>
    %72 = arith.mulf %70, %71 : vector<16x16xf32>
    %cst_45 = arith.constant 1.562500e-02 : f32
    %73 = vector.broadcast %cst_45 : f32 to vector<16x16xf32>
    %74 = arith.mulf %73, %1 : vector<16x16xf32>
    %75 = arith.subf %72, %74 : vector<16x16xf32>
    %cst_46 = arith.constant dense<0xFF800000> : vector<16xf32>
    %76 = vector.multi_reduction <maximumf>, %75, %cst_46 [1] : vector<16x16xf32> to vector<16xf32>
    %77 = vector.shape_cast %76 : vector<16xf32> to vector<16x1xf32>
    %78 = vector.broadcast %77 : vector<16x1xf32> to vector<16x16xf32>
    %79 = arith.subf %75, %78 : vector<16x16xf32>
    %80 = math.exp %79 : vector<16x16xf32>
    %cst_47 = arith.constant dense<0.000000e+00> : vector<16xf32>
    %81 = vector.multi_reduction <add>, %80, %cst_47 [1] : vector<16x16xf32> to vector<16xf32>
    %82 = vector.shape_cast %81 : vector<16xf32> to vector<16x1xf32>
    %83 = tpu.reciprocal %82 {approx = true} : vector<16x1xf32> -> vector<16x1xf32>
    %84 = vector.broadcast %83 : vector<16x1xf32> to vector<16x16xf32>
    %85 = arith.mulf %80, %84 : vector<16x16xf32>
    %86 = arith.truncf %85 : vector<16x16xf32> to vector<16x16xbf16>
    %cst_48 = arith.constant dense<0.000000e+00> : vector<16x16xf32>
    %87 = tpu.matmul %86, %69, %cst_48 {dimension_numbers = #tpu.dot_dimension_numbers<[1], [0], [0], [1], [0, 0, 1, 1], [], []>} : vector<16x16xbf16>, vector<16x16xbf16>, vector<16x16xf32> -> vector<16x16xf32>
    %88 = arith.truncf %87 : vector<16x16xf32> to vector<16x16xbf16>
    %c32_49 = arith.constant 32 : index
    %c0_50 = arith.constant 0 : index
    %89 = vector.load %arg3[%c32_49, %c0_50] : memref<64x64xbf16, #tpu.memory_space<vmem>>, vector<16x64xbf16>
    %cst_51 = arith.constant dense<0.000000e+00> : vector<16x64xf32>
    %90 = tpu.matmul %88, %89, %cst_51 {dimension_numbers = #tpu.dot_dimension_numbers<[1], [0], [0], [1], [0, 0, 1, 1], [], []>} : vector<16x16xbf16>, vector<16x64xbf16>, vector<16x64xf32> -> vector<16x64xf32>
    %91 = arith.addf %63, %90 : vector<16x64xf32>
    %c0_52 = arith.constant 0 : index
    %c0_53 = arith.constant 0 : index
    %c48 = arith.constant 48 : index
    %92 = vector.load %arg1[%c0_52, %c0_53, %c48] : memref<1x16x192xbf16, #tpu.memory_space<vmem>>, vector<1x16x16xbf16>
    %93 = vector.shape_cast %92 : vector<1x16x16xbf16> to vector<16x16xbf16>
    %c0_54 = arith.constant 0 : index
    %c0_55 = arith.constant 0 : index
    %c112 = arith.constant 112 : index
    %94 = vector.load %arg1[%c0_54, %c0_55, %c112] : memref<1x16x192xbf16, #tpu.memory_space<vmem>>, vector<1x16x16xbf16>
    %95 = vector.shape_cast %94 : vector<1x16x16xbf16> to vector<16x16xbf16>
    %c0_56 = arith.constant 0 : index
    %c0_57 = arith.constant 0 : index
    %c176 = arith.constant 176 : index
    %96 = vector.load %arg1[%c0_56, %c0_57, %c176] : memref<1x16x192xbf16, #tpu.memory_space<vmem>>, vector<1x16x16xbf16>
    %97 = vector.shape_cast %96 : vector<1x16x16xbf16> to vector<16x16xbf16>
    %cst_58 = arith.constant dense<0.000000e+00> : vector<16x16xf32>
    %98 = tpu.matmul %93, %95, %cst_58 {dimension_numbers = #tpu.dot_dimension_numbers<[1], [1], [0], [0], [0, 0, 1, 0], [], []>} : vector<16x16xbf16>, vector<16x16xbf16>, vector<16x16xf32> -> vector<16x16xf32>
    %cst_59 = arith.constant 2.500000e-01 : f32
    %99 = vector.broadcast %cst_59 : f32 to vector<16x16xf32>
    %100 = arith.mulf %98, %99 : vector<16x16xf32>
    %cst_60 = arith.constant 3.906250e-03 : f32
    %101 = vector.broadcast %cst_60 : f32 to vector<16x16xf32>
    %102 = arith.mulf %101, %1 : vector<16x16xf32>
    %103 = arith.subf %100, %102 : vector<16x16xf32>
    %cst_61 = arith.constant dense<0xFF800000> : vector<16xf32>
    %104 = vector.multi_reduction <maximumf>, %103, %cst_61 [1] : vector<16x16xf32> to vector<16xf32>
    %105 = vector.shape_cast %104 : vector<16xf32> to vector<16x1xf32>
    %106 = vector.broadcast %105 : vector<16x1xf32> to vector<16x16xf32>
    %107 = arith.subf %103, %106 : vector<16x16xf32>
    %108 = math.exp %107 : vector<16x16xf32>
    %cst_62 = arith.constant dense<0.000000e+00> : vector<16xf32>
    %109 = vector.multi_reduction <add>, %108, %cst_62 [1] : vector<16x16xf32> to vector<16xf32>
    %110 = vector.shape_cast %109 : vector<16xf32> to vector<16x1xf32>
    %111 = tpu.reciprocal %110 {approx = true} : vector<16x1xf32> -> vector<16x1xf32>
    %112 = vector.broadcast %111 : vector<16x1xf32> to vector<16x16xf32>
    %113 = arith.mulf %108, %112 : vector<16x16xf32>
    %114 = arith.truncf %113 : vector<16x16xf32> to vector<16x16xbf16>
    %cst_63 = arith.constant dense<0.000000e+00> : vector<16x16xf32>
    %115 = tpu.matmul %114, %97, %cst_63 {dimension_numbers = #tpu.dot_dimension_numbers<[1], [0], [0], [1], [0, 0, 1, 1], [], []>} : vector<16x16xbf16>, vector<16x16xbf16>, vector<16x16xf32> -> vector<16x16xf32>
    %116 = arith.truncf %115 : vector<16x16xf32> to vector<16x16xbf16>
    %c48_64 = arith.constant 48 : index
    %c0_65 = arith.constant 0 : index
    %117 = vector.load %arg3[%c48_64, %c0_65] : memref<64x64xbf16, #tpu.memory_space<vmem>>, vector<16x64xbf16>
    %cst_66 = arith.constant dense<0.000000e+00> : vector<16x64xf32>
    %118 = tpu.matmul %116, %117, %cst_66 {dimension_numbers = #tpu.dot_dimension_numbers<[1], [0], [0], [1], [0, 0, 1, 1], [], []>} : vector<16x16xbf16>, vector<16x64xbf16>, vector<16x64xf32> -> vector<16x64xf32>
    %119 = arith.addf %91, %118 : vector<16x64xf32>
    %120 = arith.truncf %119 : vector<16x64xf32> to vector<16x64xbf16>
    %c0_67 = arith.constant 0 : index
    %c0_68 = arith.constant 0 : index
    %c0_69 = arith.constant 0 : index
    %121 = vector.load %arg6[%c0_67, %c0_68, %c0_69] : memref<1x16x64xbf16, #tpu.memory_space<vmem>>, vector<1x16x64xbf16>
    %122 = vector.shape_cast %121 : vector<1x16x64xbf16> to vector<16x64xbf16>
    %123 = vector.shape_cast %120 : vector<16x64xbf16> to vector<1x16x64xbf16>
    tpu.vector_store %arg6[%c0_67, %c0_68, %c0_69], %123 {strides = array<i32>} : memref<1x16x64xbf16, #tpu.memory_space<vmem>>, vector<1x16x64xbf16>,
    return
  }
  func.func @transform_0(%arg0: i32) -> (i32, i32, i32) {
    %c0_i32 = arith.constant 0 : i32
    %c0_i32_0 = arith.constant 0 : i32
    %c0_i32_1 = arith.constant 0 : i32
    return %arg0, %c0_i32, %c0_i32_0 : i32, i32, i32
  }
  func.func @transform_1(%arg0: i32) -> (i32, i32, i32) {
    %c0_i32 = arith.constant 0 : i32
    %c0_i32_0 = arith.constant 0 : i32
    %c0_i32_1 = arith.constant 0 : i32
    return %arg0, %c0_i32, %c0_i32_0 : i32, i32, i32
  }
  func.func @transform_2(%arg0: i32) -> (i32, i32) {
    %c0_i32 = arith.constant 0 : i32
    %c0_i32_0 = arith.constant 0 : i32
    %c0_i32_1 = arith.constant 0 : i32
    return %c0_i32, %c0_i32_0 : i32, i32
  }
  func.func @transform_3(%arg0: i32) -> (i32, i32) {
    %c0_i32 = arith.constant 0 : i32
    %c0_i32_0 = arith.constant 0 : i32
    %c0_i32_1 = arith.constant 0 : i32
    return %c0_i32, %c0_i32_0 : i32, i32
  }
  func.func @transform_4(%arg0: i32) -> (i32, i32, i32) {
    %c0_i32 = arith.constant 0 : i32
    %c0_i32_0 = arith.constant 0 : i32
    %c0_i32_1 = arith.constant 0 : i32
    return %arg0, %c0_i32, %c0_i32_0 : i32, i32, i32
  }
  func.func @transform_5(%arg0: i32) -> (i32, i32, i32) {
    %c0_i32 = arith.constant 0 : i32
    %c0_i32_0 = arith.constant 0 : i32
    %c0_i32_1 = arith.constant 0 : i32
    return %arg0, %c0_i32, %c0_i32_0 : i32, i32, i32
  }
}

module attributes {stable_mosaic.version = 11 : i64} {
  func.func @_ln_matmul_kernel(%arg0: i32, %arg1: i32, %arg2: memref<32x64xbf16, #tpu.memory_space<vmem>>, %arg3: memref<1x64xf32, #tpu.memory_space<vmem>>, %arg4: memref<1x64xf32, #tpu.memory_space<vmem>>, %arg5: memref<64x256xbf16, #tpu.memory_space<vmem>>, %arg6: memref<1x256xf32, #tpu.memory_space<vmem>>, %arg7: memref<32x256xbf16, #tpu.memory_space<vmem>>) attributes {dimension_semantics = [#tpu.dimension_semantics<parallel>, #tpu.dimension_semantics<parallel>], iteration_bounds = array<i64: 1, 1>, scalar_prefetch = 0 : i64, scratch_operands = 0 : i64, tpu.core_type = #tpu.core_type<tc>, window_params = [{transform_indices = @transform_0, window_bounds = array<i64: 32, 64>}, {pipeline_mode = #tpu.pipeline_mode<synchronous>, transform_indices = @transform_1, window_bounds = array<i64: 1, 64>}, {pipeline_mode = #tpu.pipeline_mode<synchronous>, transform_indices = @transform_2, window_bounds = array<i64: 1, 64>}, {transform_indices = @transform_3, window_bounds = array<i64: 64, 256>}, {transform_indices = @transform_4, window_bounds = array<i64: 1, 256>}, {transform_indices = @transform_5, window_bounds = array<i64: 32, 256>}]} {
    %c0 = arith.constant 0 : index
    %c0_0 = arith.constant 0 : index
    %0 = vector.load %arg2[%c0, %c0_0] : memref<32x64xbf16, #tpu.memory_space<vmem>>, vector<32x64xbf16>
    %1 = arith.extf %0 : vector<32x64xbf16> to vector<32x64xf32>
    %cst = arith.constant dense<0.000000e+00> : vector<32xf32>
    %2 = vector.multi_reduction <add>, %1, %cst [1] : vector<32x64xf32> to vector<32xf32>
    %3 = vector.shape_cast %2 : vector<32xf32> to vector<32x1xf32>
    %cst_1 = arith.constant 6.400000e+01 : f32
    %4 = vector.broadcast %cst_1 : f32 to vector<32x1xf32>
    %5 = arith.divf %3, %4 : vector<32x1xf32>
    %6 = vector.broadcast %5 : vector<32x1xf32> to vector<32x64xf32>
    %7 = arith.subf %1, %6 : vector<32x64xf32>
    %8 = arith.mulf %7, %7 : vector<32x64xf32>
    %cst_2 = arith.constant dense<0.000000e+00> : vector<32xf32>
    %9 = vector.multi_reduction <add>, %8, %cst_2 [1] : vector<32x64xf32> to vector<32xf32>
    %10 = vector.shape_cast %9 : vector<32xf32> to vector<32x1xf32>
    %cst_3 = arith.constant 6.400000e+01 : f32
    %11 = vector.broadcast %cst_3 : f32 to vector<32x1xf32>
    %12 = arith.divf %10, %11 : vector<32x1xf32>
    %13 = vector.broadcast %5 : vector<32x1xf32> to vector<32x64xf32>
    %14 = arith.subf %1, %13 : vector<32x64xf32>
    %cst_4 = arith.constant 9.99999974E-6 : f32
    %15 = vector.broadcast %cst_4 : f32 to vector<32x1xf32>
    %16 = arith.addf %12, %15 : vector<32x1xf32>
    %17 = math.rsqrt %16 : vector<32x1xf32>
    %18 = vector.broadcast %17 : vector<32x1xf32> to vector<32x64xf32>
    %19 = arith.mulf %14, %18 : vector<32x64xf32>
    %c0_5 = arith.constant 0 : index
    %c0_6 = arith.constant 0 : index
    %20 = vector.load %arg3[%c0_5, %c0_6] : memref<1x64xf32, #tpu.memory_space<vmem>>, vector<1x64xf32>
    %21 = vector.broadcast %20 : vector<1x64xf32> to vector<32x64xf32>
    %22 = arith.mulf %19, %21 : vector<32x64xf32>
    %c0_7 = arith.constant 0 : index
    %c0_8 = arith.constant 0 : index
    %23 = vector.load %arg4[%c0_7, %c0_8] : memref<1x64xf32, #tpu.memory_space<vmem>>, vector<1x64xf32>
    %24 = vector.broadcast %23 : vector<1x64xf32> to vector<32x64xf32>
    %25 = arith.addf %22, %24 : vector<32x64xf32>
    %26 = arith.truncf %25 : vector<32x64xf32> to vector<32x64xbf16>
    %c0_9 = arith.constant 0 : index
    %c0_10 = arith.constant 0 : index
    %27 = vector.load %arg5[%c0_9, %c0_10] : memref<64x256xbf16, #tpu.memory_space<vmem>>, vector<64x256xbf16>
    %cst_11 = arith.constant dense<0.000000e+00> : vector<32x256xf32>
    %28 = tpu.matmul %26, %27, %cst_11 {dimension_numbers = #tpu.dot_dimension_numbers<[1], [0], [0], [1], [0, 0, 1, 1], [], []>} : vector<32x64xbf16>, vector<64x256xbf16>, vector<32x256xf32> -> vector<32x256xf32>
    %c0_12 = arith.constant 0 : index
    %c0_13 = arith.constant 0 : index
    %29 = vector.load %arg6[%c0_12, %c0_13] : memref<1x256xf32, #tpu.memory_space<vmem>>, vector<1x256xf32>
    %30 = vector.broadcast %29 : vector<1x256xf32> to vector<32x256xf32>
    %31 = arith.addf %28, %30 : vector<32x256xf32>
    %cst_14 = arith.constant 5.000000e-01 : f32
    %32 = vector.broadcast %cst_14 : f32 to vector<32x256xf32>
    %33 = arith.mulf %32, %31 : vector<32x256xf32>
    %cst_15 = arith.constant 4.471500e-02 : f32
    %34 = vector.broadcast %cst_15 : f32 to vector<32x256xf32>
    %35 = arith.mulf %34, %31 : vector<32x256xf32>
    %36 = arith.mulf %35, %31 : vector<32x256xf32>
    %37 = arith.mulf %36, %31 : vector<32x256xf32>
    %38 = arith.addf %31, %37 : vector<32x256xf32>
    %cst_16 = arith.constant 0.797884583 : f32
    %39 = vector.broadcast %cst_16 : f32 to vector<32x256xf32>
    %40 = arith.mulf %39, %38 : vector<32x256xf32>
    %41 = math.tanh %40 : vector<32x256xf32>
    %cst_17 = arith.constant 1.000000e+00 : f32
    %42 = vector.broadcast %cst_17 : f32 to vector<32x256xf32>
    %43 = arith.addf %42, %41 : vector<32x256xf32>
    %44 = arith.mulf %33, %43 : vector<32x256xf32>
    %45 = arith.truncf %44 : vector<32x256xf32> to vector<32x256xbf16>
    %c0_18 = arith.constant 0 : index
    %c0_19 = arith.constant 0 : index
    %46 = vector.load %arg7[%c0_18, %c0_19] : memref<32x256xbf16, #tpu.memory_space<vmem>>, vector<32x256xbf16>
    tpu.vector_store %arg7[%c0_18, %c0_19], %45 {strides = array<i32>} : memref<32x256xbf16, #tpu.memory_space<vmem>>, vector<32x256xbf16>,
    return
  }
  func.func @transform_0(%arg0: i32, %arg1: i32) -> (i32, i32) {
    %c0_i32 = arith.constant 0 : i32
    %c0_i32_0 = arith.constant 0 : i32
    return %arg0, %c0_i32 : i32, i32
  }
  func.func @transform_1(%arg0: i32, %arg1: i32) -> (i32, i32) {
    %c0_i32 = arith.constant 0 : i32
    %c0_i32_0 = arith.constant 0 : i32
    %c0_i32_1 = arith.constant 0 : i32
    return %c0_i32, %c0_i32_0 : i32, i32
  }
  func.func @transform_2(%arg0: i32, %arg1: i32) -> (i32, i32) {
    %c0_i32 = arith.constant 0 : i32
    %c0_i32_0 = arith.constant 0 : i32
    %c0_i32_1 = arith.constant 0 : i32
    return %c0_i32, %c0_i32_0 : i32, i32
  }
  func.func @transform_3(%arg0: i32, %arg1: i32) -> (i32, i32) {
    %c0_i32 = arith.constant 0 : i32
    %c0_i32_0 = arith.constant 0 : i32
    return %c0_i32, %arg1 : i32, i32
  }
  func.func @transform_4(%arg0: i32, %arg1: i32) -> (i32, i32) {
    %c0_i32 = arith.constant 0 : i32
    %c0_i32_0 = arith.constant 0 : i32
    return %c0_i32, %arg1 : i32, i32
  }
  func.func @transform_5(%arg0: i32, %arg1: i32) -> (i32, i32) {
    %c0_i32 = arith.constant 0 : i32
    return %arg0, %arg1 : i32, i32
  }
}

module attributes {stable_mosaic.version = 11 : i64} {
  func.func @_matmul_kernel(%arg0: i32, %arg1: i32, %arg2: i32, %arg3: memref<32x256xbf16, #tpu.memory_space<vmem>>, %arg4: memref<256x64xbf16, #tpu.memory_space<vmem>>, %arg5: memref<1x64xf32, #tpu.memory_space<vmem>>, %arg6: memref<32x64xbf16, #tpu.memory_space<vmem>>, %arg7: memref<32x64xbf16, #tpu.memory_space<vmem>>, %arg8: memref<32x64xf32, #tpu.memory_space<vmem>>) attributes {dimension_semantics = [#tpu.dimension_semantics<parallel>, #tpu.dimension_semantics<parallel>, #tpu.dimension_semantics<arbitrary>], iteration_bounds = array<i64: 1, 1, 1>, scalar_prefetch = 0 : i64, scratch_operands = 1 : i64, tpu.core_type = #tpu.core_type<tc>, window_params = [{transform_indices = @transform_0, window_bounds = array<i64: 32, 256>}, {transform_indices = @transform_1, window_bounds = array<i64: 256, 64>}, {transform_indices = @transform_2, window_bounds = array<i64: 1, 64>}, {transform_indices = @transform_3, window_bounds = array<i64: 32, 64>}, {transform_indices = @transform_4, window_bounds = array<i64: 32, 64>}]} {
    %c0_i32 = arith.constant 0 : i32
    %0 = arith.cmpi eq, %arg2, %c0_i32 : i32
    %1 = arith.extui %0 : i1 to i32
    %c0_i32_0 = arith.constant 0 : i32
    %2 = arith.cmpi ne, %1, %c0_i32_0 : i32
    scf.if %2 {
      %cst_10 = arith.constant 0.000000e+00 : f32
      %12 = vector.broadcast %cst_10 : f32 to vector<32x64xf32>
      %c0_11 = arith.constant 0 : index
      %c0_12 = arith.constant 0 : index
      %13 = vector.load %arg8[%c0_11, %c0_12] : memref<32x64xf32, #tpu.memory_space<vmem>>, vector<32x64xf32>
      tpu.vector_store %arg8[%c0_11, %c0_12], %12 {strides = array<i32>} : memref<32x64xf32, #tpu.memory_space<vmem>>, vector<32x64xf32>,
    } else {
    }
    %c0 = arith.constant 0 : index
    %c0_1 = arith.constant 0 : index
    %3 = vector.load %arg8[%c0, %c0_1] : memref<32x64xf32, #tpu.memory_space<vmem>>, vector<32x64xf32>
    %c0_2 = arith.constant 0 : index
    %c0_3 = arith.constant 0 : index
    %4 = vector.load %arg3[%c0_2, %c0_3] : memref<32x256xbf16, #tpu.memory_space<vmem>>, vector<32x256xbf16>
    %c0_4 = arith.constant 0 : index
    %c0_5 = arith.constant 0 : index
    %5 = vector.load %arg4[%c0_4, %c0_5] : memref<256x64xbf16, #tpu.memory_space<vmem>>, vector<256x64xbf16>
    %cst = arith.constant dense<0.000000e+00> : vector<32x64xf32>
    %6 = tpu.matmul %4, %5, %cst {dimension_numbers = #tpu.dot_dimension_numbers<[1], [0], [0], [1], [0, 0, 1, 1], [], []>} : vector<32x256xbf16>, vector<256x64xbf16>, vector<32x64xf32> -> vector<32x64xf32>
    %7 = arith.addf %3, %6 : vector<32x64xf32>
    %c0_6 = arith.constant 0 : index
    %c0_7 = arith.constant 0 : index
    %8 = vector.load %arg8[%c0_6, %c0_7] : memref<32x64xf32, #tpu.memory_space<vmem>>, vector<32x64xf32>
    tpu.vector_store %arg8[%c0_6, %c0_7], %7 {strides = array<i32>} : memref<32x64xf32, #tpu.memory_space<vmem>>, vector<32x64xf32>,
    %c0_i32_8 = arith.constant 0 : i32
    %9 = arith.cmpi eq, %arg2, %c0_i32_8 : i32
    %10 = arith.extui %9 : i1 to i32
    %c0_i32_9 = arith.constant 0 : i32
    %11 = arith.cmpi ne, %10, %c0_i32_9 : i32
    scf.if %11 {
      %c0_10 = arith.constant 0 : index
      %c0_11 = arith.constant 0 : index
      %12 = vector.load %arg8[%c0_10, %c0_11] : memref<32x64xf32, #tpu.memory_space<vmem>>, vector<32x64xf32>
      %c0_12 = arith.constant 0 : index
      %c0_13 = arith.constant 0 : index
      %13 = vector.load %arg5[%c0_12, %c0_13] : memref<1x64xf32, #tpu.memory_space<vmem>>, vector<1x64xf32>
      %14 = vector.broadcast %13 : vector<1x64xf32> to vector<32x64xf32>
      %15 = arith.addf %12, %14 : vector<32x64xf32>
      %c0_14 = arith.constant 0 : index
      %c0_15 = arith.constant 0 : index
      %16 = vector.load %arg6[%c0_14, %c0_15] : memref<32x64xbf16, #tpu.memory_space<vmem>>, vector<32x64xbf16>
      %17 = arith.extf %16 : vector<32x64xbf16> to vector<32x64xf32>
      %18 = arith.addf %15, %17 : vector<32x64xf32>
      %19 = arith.truncf %18 : vector<32x64xf32> to vector<32x64xbf16>
      %c0_16 = arith.constant 0 : index
      %c0_17 = arith.constant 0 : index
      %20 = vector.load %arg7[%c0_16, %c0_17] : memref<32x64xbf16, #tpu.memory_space<vmem>>, vector<32x64xbf16>
      tpu.vector_store %arg7[%c0_16, %c0_17], %19 {strides = array<i32>} : memref<32x64xbf16, #tpu.memory_space<vmem>>, vector<32x64xbf16>,
    } else {
    }
    return
  }
  func.func @transform_0(%arg0: i32, %arg1: i32, %arg2: i32) -> (i32, i32) {
    %c0_i32 = arith.constant 0 : i32
    return %arg0, %arg2 : i32, i32
  }
  func.func @transform_1(%arg0: i32, %arg1: i32, %arg2: i32) -> (i32, i32) {
    %c0_i32 = arith.constant 0 : i32
    return %arg2, %arg1 : i32, i32
  }
  func.func @transform_2(%arg0: i32, %arg1: i32, %arg2: i32) -> (i32, i32) {
    %c0_i32 = arith.constant 0 : i32
    %c0_i32_0 = arith.constant 0 : i32
    return %c0_i32, %arg1 : i32, i32
  }
  func.func @transform_3(%arg0: i32, %arg1: i32, %arg2: i32) -> (i32, i32) {
    %c0_i32 = arith.constant 0 : i32
    return %arg0, %arg1 : i32, i32
  }
  func.func @transform_4(%arg0: i32, %arg1: i32, %arg2: i32) -> (i32, i32) {
    %c0_i32 = arith.constant 0 : i32
    return %arg0, %arg1 : i32, i32
  }
}

module attributes {stable_mosaic.version = 11 : i64} {
  func.func @_ln_mean_gap_kernel(%arg0: i32, %arg1: memref<1x16x64xbf16, #tpu.memory_space<vmem>>, %arg2: memref<1x64xf32, #tpu.memory_space<vmem>>, %arg3: memref<1x64xf32, #tpu.memory_space<vmem>>, %arg4: memref<1x64xf32, #tpu.memory_space<vmem>>, %arg5: memref<1x64xf32, #tpu.memory_space<vmem>>, %arg6: memref<64x256xbf16, #tpu.memory_space<vmem>>, %arg7: memref<1x256xf32, #tpu.memory_space<vmem>>, %arg8: memref<1x1x256xbf16, #tpu.memory_space<vmem>>) attributes {dimension_semantics = [#tpu.dimension_semantics<parallel>], iteration_bounds = array<i64: 2>, scalar_prefetch = 0 : i64, scratch_operands = 0 : i64, tpu.core_type = #tpu.core_type<tc>, window_params = [{transform_indices = @transform_0, window_bounds = array<i64: 1, 16, 64>}, {pipeline_mode = #tpu.pipeline_mode<synchronous>, transform_indices = @transform_1, window_bounds = array<i64: 1, 64>}, {pipeline_mode = #tpu.pipeline_mode<synchronous>, transform_indices = @transform_2, window_bounds = array<i64: 1, 64>}, {pipeline_mode = #tpu.pipeline_mode<synchronous>, transform_indices = @transform_3, window_bounds = array<i64: 1, 64>}, {pipeline_mode = #tpu.pipeline_mode<synchronous>, transform_indices = @transform_4, window_bounds = array<i64: 1, 64>}, {pipeline_mode = #tpu.pipeline_mode<synchronous>, transform_indices = @transform_5, window_bounds = array<i64: 64, 256>}, {pipeline_mode = #tpu.pipeline_mode<synchronous>, transform_indices = @transform_6, window_bounds = array<i64: 1, 256>}, {transform_indices = @transform_7, window_bounds = array<i64: 1, 1, 256>}]} {
    %c0 = arith.constant 0 : index
    %c0_0 = arith.constant 0 : index
    %c0_1 = arith.constant 0 : index
    %0 = vector.load %arg1[%c0, %c0_0, %c0_1] : memref<1x16x64xbf16, #tpu.memory_space<vmem>>, vector<1x16x64xbf16>
    %1 = vector.shape_cast %0 : vector<1x16x64xbf16> to vector<16x64xbf16>
    %2 = arith.extf %1 : vector<16x64xbf16> to vector<16x64xf32>
    %cst = arith.constant dense<0.000000e+00> : vector<16xf32>
    %3 = vector.multi_reduction <add>, %2, %cst [1] : vector<16x64xf32> to vector<16xf32>
    %4 = vector.shape_cast %3 : vector<16xf32> to vector<16x1xf32>
    %cst_2 = arith.constant 6.400000e+01 : f32
    %5 = vector.broadcast %cst_2 : f32 to vector<16x1xf32>
    %6 = arith.divf %4, %5 : vector<16x1xf32>
    %7 = vector.broadcast %6 : vector<16x1xf32> to vector<16x64xf32>
    %8 = arith.subf %2, %7 : vector<16x64xf32>
    %9 = arith.mulf %8, %8 : vector<16x64xf32>
    %cst_3 = arith.constant dense<0.000000e+00> : vector<16xf32>
    %10 = vector.multi_reduction <add>, %9, %cst_3 [1] : vector<16x64xf32> to vector<16xf32>
    %11 = vector.shape_cast %10 : vector<16xf32> to vector<16x1xf32>
    %cst_4 = arith.constant 6.400000e+01 : f32
    %12 = vector.broadcast %cst_4 : f32 to vector<16x1xf32>
    %13 = arith.divf %11, %12 : vector<16x1xf32>
    %14 = vector.broadcast %6 : vector<16x1xf32> to vector<16x64xf32>
    %15 = arith.subf %2, %14 : vector<16x64xf32>
    %cst_5 = arith.constant 9.99999974E-6 : f32
    %16 = vector.broadcast %cst_5 : f32 to vector<16x1xf32>
    %17 = arith.addf %13, %16 : vector<16x1xf32>
    %18 = math.rsqrt %17 : vector<16x1xf32>
    %19 = vector.broadcast %18 : vector<16x1xf32> to vector<16x64xf32>
    %20 = arith.mulf %15, %19 : vector<16x64xf32>
    %c0_6 = arith.constant 0 : index
    %c0_7 = arith.constant 0 : index
    %21 = vector.load %arg2[%c0_6, %c0_7] : memref<1x64xf32, #tpu.memory_space<vmem>>, vector<1x64xf32>
    %22 = vector.broadcast %21 : vector<1x64xf32> to vector<16x64xf32>
    %23 = arith.mulf %20, %22 : vector<16x64xf32>
    %c0_8 = arith.constant 0 : index
    %c0_9 = arith.constant 0 : index
    %24 = vector.load %arg3[%c0_8, %c0_9] : memref<1x64xf32, #tpu.memory_space<vmem>>, vector<1x64xf32>
    %25 = vector.broadcast %24 : vector<1x64xf32> to vector<16x64xf32>
    %26 = arith.addf %23, %25 : vector<16x64xf32>
    %cst_10 = arith.constant dense<0.000000e+00> : vector<64xf32>
    %27 = vector.multi_reduction <add>, %26, %cst_10 [0] : vector<16x64xf32> to vector<64xf32>
    %28 = vector.shape_cast %27 : vector<64xf32> to vector<1x64xf32>
    %cst_11 = arith.constant 6.250000e-02 : f32
    %29 = vector.broadcast %cst_11 : f32 to vector<1x64xf32>
    %30 = arith.mulf %28, %29 : vector<1x64xf32>
    %cst_12 = arith.constant dense<0.000000e+00> : vector<1xf32>
    %31 = vector.multi_reduction <add>, %30, %cst_12 [1] : vector<1x64xf32> to vector<1xf32>
    %32 = vector.shape_cast %31 : vector<1xf32> to vector<1x1xf32>
    %cst_13 = arith.constant 6.400000e+01 : f32
    %33 = vector.broadcast %cst_13 : f32 to vector<1x1xf32>
    %34 = arith.divf %32, %33 : vector<1x1xf32>
    %35 = vector.broadcast %34 : vector<1x1xf32> to vector<1x64xf32>
    %36 = arith.subf %30, %35 : vector<1x64xf32>
    %37 = arith.mulf %36, %36 : vector<1x64xf32>
    %cst_14 = arith.constant dense<0.000000e+00> : vector<1xf32>
    %38 = vector.multi_reduction <add>, %37, %cst_14 [1] : vector<1x64xf32> to vector<1xf32>
    %39 = vector.shape_cast %38 : vector<1xf32> to vector<1x1xf32>
    %cst_15 = arith.constant 6.400000e+01 : f32
    %40 = vector.broadcast %cst_15 : f32 to vector<1x1xf32>
    %41 = arith.divf %39, %40 : vector<1x1xf32>
    %42 = vector.broadcast %34 : vector<1x1xf32> to vector<1x64xf32>
    %43 = arith.subf %30, %42 : vector<1x64xf32>
    %cst_16 = arith.constant 9.99999974E-6 : f32
    %44 = vector.broadcast %cst_16 : f32 to vector<1x1xf32>
    %45 = arith.addf %41, %44 : vector<1x1xf32>
    %46 = math.rsqrt %45 : vector<1x1xf32>
    %47 = vector.broadcast %46 : vector<1x1xf32> to vector<1x64xf32>
    %48 = arith.mulf %43, %47 : vector<1x64xf32>
    %c0_17 = arith.constant 0 : index
    %c0_18 = arith.constant 0 : index
    %49 = vector.load %arg4[%c0_17, %c0_18] : memref<1x64xf32, #tpu.memory_space<vmem>>, vector<1x64xf32>
    %50 = arith.mulf %48, %49 : vector<1x64xf32>
    %c0_19 = arith.constant 0 : index
    %c0_20 = arith.constant 0 : index
    %51 = vector.load %arg5[%c0_19, %c0_20] : memref<1x64xf32, #tpu.memory_space<vmem>>, vector<1x64xf32>
    %52 = arith.addf %50, %51 : vector<1x64xf32>
    %53 = arith.truncf %52 : vector<1x64xf32> to vector<1x64xbf16>
    %c0_21 = arith.constant 0 : index
    %c0_22 = arith.constant 0 : index
    %54 = vector.load %arg6[%c0_21, %c0_22] : memref<64x256xbf16, #tpu.memory_space<vmem>>, vector<64x256xbf16>
    %cst_23 = arith.constant dense<0.000000e+00> : vector<1x256xf32>
    %55 = tpu.matmul %53, %54, %cst_23 {dimension_numbers = #tpu.dot_dimension_numbers<[1], [0], [0], [1], [0, 0, 1, 1], [], []>} : vector<1x64xbf16>, vector<64x256xbf16>, vector<1x256xf32> -> vector<1x256xf32>
    %c0_24 = arith.constant 0 : index
    %c0_25 = arith.constant 0 : index
    %56 = vector.load %arg7[%c0_24, %c0_25] : memref<1x256xf32, #tpu.memory_space<vmem>>, vector<1x256xf32>
    %57 = arith.addf %55, %56 : vector<1x256xf32>
    %cst_26 = arith.constant 5.000000e-01 : f32
    %58 = vector.broadcast %cst_26 : f32 to vector<1x256xf32>
    %59 = arith.mulf %58, %57 : vector<1x256xf32>
    %cst_27 = arith.constant 4.471500e-02 : f32
    %60 = vector.broadcast %cst_27 : f32 to vector<1x256xf32>
    %61 = arith.mulf %60, %57 : vector<1x256xf32>
    %62 = arith.mulf %61, %57 : vector<1x256xf32>
    %63 = arith.mulf %62, %57 : vector<1x256xf32>
    %64 = arith.addf %57, %63 : vector<1x256xf32>
    %cst_28 = arith.constant 0.797884583 : f32
    %65 = vector.broadcast %cst_28 : f32 to vector<1x256xf32>
    %66 = arith.mulf %65, %64 : vector<1x256xf32>
    %67 = math.tanh %66 : vector<1x256xf32>
    %cst_29 = arith.constant 1.000000e+00 : f32
    %68 = vector.broadcast %cst_29 : f32 to vector<1x256xf32>
    %69 = arith.addf %68, %67 : vector<1x256xf32>
    %70 = arith.mulf %59, %69 : vector<1x256xf32>
    %71 = arith.truncf %70 : vector<1x256xf32> to vector<1x256xbf16>
    %c0_30 = arith.constant 0 : index
    %c0_31 = arith.constant 0 : index
    %c0_32 = arith.constant 0 : index
    %72 = vector.load %arg8[%c0_30, %c0_31, %c0_32] : memref<1x1x256xbf16, #tpu.memory_space<vmem>>, vector<1x1x256xbf16>
    %73 = vector.shape_cast %72 : vector<1x1x256xbf16> to vector<1x256xbf16>
    %74 = vector.shape_cast %71 : vector<1x256xbf16> to vector<1x1x256xbf16>
    tpu.vector_store %arg8[%c0_30, %c0_31, %c0_32], %74 {strides = array<i32>} : memref<1x1x256xbf16, #tpu.memory_space<vmem>>, vector<1x1x256xbf16>,
    return
  }
  func.func @transform_0(%arg0: i32) -> (i32, i32, i32) {
    %c0_i32 = arith.constant 0 : i32
    %c0_i32_0 = arith.constant 0 : i32
    %c0_i32_1 = arith.constant 0 : i32
    return %arg0, %c0_i32, %c0_i32_0 : i32, i32, i32
  }
  func.func @transform_1(%arg0: i32) -> (i32, i32) {
    %c0_i32 = arith.constant 0 : i32
    %c0_i32_0 = arith.constant 0 : i32
    %c0_i32_1 = arith.constant 0 : i32
    return %c0_i32, %c0_i32_0 : i32, i32
  }
  func.func @transform_2(%arg0: i32) -> (i32, i32) {
    %c0_i32 = arith.constant 0 : i32
    %c0_i32_0 = arith.constant 0 : i32
    %c0_i32_1 = arith.constant 0 : i32
    return %c0_i32, %c0_i32_0 : i32, i32
  }
  func.func @transform_3(%arg0: i32) -> (i32, i32) {
    %c0_i32 = arith.constant 0 : i32
    %c0_i32_0 = arith.constant 0 : i32
    %c0_i32_1 = arith.constant 0 : i32
    return %c0_i32, %c0_i32_0 : i32, i32
  }
  func.func @transform_4(%arg0: i32) -> (i32, i32) {
    %c0_i32 = arith.constant 0 : i32
    %c0_i32_0 = arith.constant 0 : i32
    %c0_i32_1 = arith.constant 0 : i32
    return %c0_i32, %c0_i32_0 : i32, i32
  }
  func.func @transform_5(%arg0: i32) -> (i32, i32) {
    %c0_i32 = arith.constant 0 : i32
    %c0_i32_0 = arith.constant 0 : i32
    %c0_i32_1 = arith.constant 0 : i32
    return %c0_i32, %c0_i32_0 : i32, i32
  }
  func.func @transform_6(%arg0: i32) -> (i32, i32) {
    %c0_i32 = arith.constant 0 : i32
    %c0_i32_0 = arith.constant 0 : i32
    %c0_i32_1 = arith.constant 0 : i32
    return %c0_i32, %c0_i32_0 : i32, i32
  }
  func.func @transform_7(%arg0: i32) -> (i32, i32, i32) {
    %c0_i32 = arith.constant 0 : i32
    %c0_i32_0 = arith.constant 0 : i32
    %c0_i32_1 = arith.constant 0 : i32
    return %arg0, %c0_i32, %c0_i32_0 : i32, i32, i32
  }
}

module attributes {stable_mosaic.version = 11 : i64} {
  func.func @_matmul_kernel(%arg0: i32, %arg1: i32, %arg2: i32, %arg3: memref<2x256xbf16, #tpu.memory_space<vmem>>, %arg4: memref<256x64xbf16, #tpu.memory_space<vmem>>, %arg5: memref<1x64xf32, #tpu.memory_space<vmem>>, %arg6: memref<2x64xf32, #tpu.memory_space<vmem>>, %arg7: memref<2x64xf32, #tpu.memory_space<vmem>>) attributes {dimension_semantics = [#tpu.dimension_semantics<parallel>, #tpu.dimension_semantics<parallel>, #tpu.dimension_semantics<arbitrary>], iteration_bounds = array<i64: 1, 1, 1>, scalar_prefetch = 0 : i64, scratch_operands = 1 : i64, tpu.core_type = #tpu.core_type<tc>, window_params = [{transform_indices = @transform_0, window_bounds = array<i64: 2, 256>}, {transform_indices = @transform_1, window_bounds = array<i64: 256, 64>}, {transform_indices = @transform_2, window_bounds = array<i64: 1, 64>}, {transform_indices = @transform_3, window_bounds = array<i64: 2, 64>}]} {
    %c0_i32 = arith.constant 0 : i32
    %0 = arith.cmpi eq, %arg2, %c0_i32 : i32
    %1 = arith.extui %0 : i1 to i32
    %c0_i32_0 = arith.constant 0 : i32
    %2 = arith.cmpi ne, %1, %c0_i32_0 : i32
    scf.if %2 {
      %cst_10 = arith.constant 0.000000e+00 : f32
      %12 = vector.broadcast %cst_10 : f32 to vector<2x64xf32>
      %c0_11 = arith.constant 0 : index
      %c0_12 = arith.constant 0 : index
      %13 = vector.load %arg7[%c0_11, %c0_12] : memref<2x64xf32, #tpu.memory_space<vmem>>, vector<2x64xf32>
      tpu.vector_store %arg7[%c0_11, %c0_12], %12 {strides = array<i32>} : memref<2x64xf32, #tpu.memory_space<vmem>>, vector<2x64xf32>,
    } else {
    }
    %c0 = arith.constant 0 : index
    %c0_1 = arith.constant 0 : index
    %3 = vector.load %arg7[%c0, %c0_1] : memref<2x64xf32, #tpu.memory_space<vmem>>, vector<2x64xf32>
    %c0_2 = arith.constant 0 : index
    %c0_3 = arith.constant 0 : index
    %4 = vector.load %arg3[%c0_2, %c0_3] : memref<2x256xbf16, #tpu.memory_space<vmem>>, vector<2x256xbf16>
    %c0_4 = arith.constant 0 : index
    %c0_5 = arith.constant 0 : index
    %5 = vector.load %arg4[%c0_4, %c0_5] : memref<256x64xbf16, #tpu.memory_space<vmem>>, vector<256x64xbf16>
    %cst = arith.constant dense<0.000000e+00> : vector<2x64xf32>
    %6 = tpu.matmul %4, %5, %cst {dimension_numbers = #tpu.dot_dimension_numbers<[1], [0], [0], [1], [0, 0, 1, 1], [], []>} : vector<2x256xbf16>, vector<256x64xbf16>, vector<2x64xf32> -> vector<2x64xf32>
    %7 = arith.addf %3, %6 : vector<2x64xf32>
    %c0_6 = arith.constant 0 : index
    %c0_7 = arith.constant 0 : index
    %8 = vector.load %arg7[%c0_6, %c0_7] : memref<2x64xf32, #tpu.memory_space<vmem>>, vector<2x64xf32>
    tpu.vector_store %arg7[%c0_6, %c0_7], %7 {strides = array<i32>} : memref<2x64xf32, #tpu.memory_space<vmem>>, vector<2x64xf32>,
    %c0_i32_8 = arith.constant 0 : i32
    %9 = arith.cmpi eq, %arg2, %c0_i32_8 : i32
    %10 = arith.extui %9 : i1 to i32
    %c0_i32_9 = arith.constant 0 : i32
    %11 = arith.cmpi ne, %10, %c0_i32_9 : i32
    scf.if %11 {
      %c0_10 = arith.constant 0 : index
      %c0_11 = arith.constant 0 : index
      %12 = vector.load %arg7[%c0_10, %c0_11] : memref<2x64xf32, #tpu.memory_space<vmem>>, vector<2x64xf32>
      %c0_12 = arith.constant 0 : index
      %c0_13 = arith.constant 0 : index
      %13 = vector.load %arg5[%c0_12, %c0_13] : memref<1x64xf32, #tpu.memory_space<vmem>>, vector<1x64xf32>
      %14 = vector.broadcast %13 : vector<1x64xf32> to vector<2x64xf32>
      %15 = arith.addf %12, %14 : vector<2x64xf32>
      %c0_14 = arith.constant 0 : index
      %c0_15 = arith.constant 0 : index
      %16 = vector.load %arg6[%c0_14, %c0_15] : memref<2x64xf32, #tpu.memory_space<vmem>>, vector<2x64xf32>
      tpu.vector_store %arg6[%c0_14, %c0_15], %15 {strides = array<i32>} : memref<2x64xf32, #tpu.memory_space<vmem>>, vector<2x64xf32>,
    } else {
    }
    return
  }
  func.func @transform_0(%arg0: i32, %arg1: i32, %arg2: i32) -> (i32, i32) {
    %c0_i32 = arith.constant 0 : i32
    return %arg0, %arg2 : i32, i32
  }
  func.func @transform_1(%arg0: i32, %arg1: i32, %arg2: i32) -> (i32, i32) {
    %c0_i32 = arith.constant 0 : i32
    return %arg2, %arg1 : i32, i32
  }
  func.func @transform_2(%arg0: i32, %arg1: i32, %arg2: i32) -> (i32, i32) {
    %c0_i32 = arith.constant 0 : i32
    %c0_i32_0 = arith.constant 0 : i32
    return %c0_i32, %arg1 : i32, i32
  }
  func.func @transform_3(%arg0: i32, %arg1: i32, %arg2: i32) -> (i32, i32) {
    %c0_i32 = arith.constant 0 : i32
    return %arg0, %arg1 : i32, i32
  }
}

</mosaic_0001>

<bundles_post_ra>
// kernel: croma_forward.11
= control target key start
LH: loop header
LB: loop body
LE: loop exit
PB: predicated region body
PF: predicated region fallthrough
CT: control target
= control target key end

     0   :  { %vm19_vm0 = vcmask 523264   ;;  %v211_v1 = vmov 0.0   ;;  %vm66_vm1 = vcmask 392192   ;;  %vm165_vm2 = vcmask 519168   ;;  %s270_s1 = inlined_call_operand.vmem [shape: bf16[48,64], index: 1, kind: input, shape index: {}]   ;;  %s271_s0 = inlined_call_operand.vmem [shape: bf16[32,48], index: 0, kind: input, shape index: {}]   ;;  %s272_s2 = inlined_call_operand.vmem [shape: f32[1,64], index: 2, kind: input, shape index: {}]   ;;  %s273_s3 = inlined_call_operand.vmem [shape: bf16[32,64], index: 3, kind: output, shape index: {}]  }
   0x1   :  { %v206_v0 = vld [vmem:[%s270_s1] sm:$0xff]   ;;  %22 = vst.msk [vmem:[#allocation2 + $0x10] sm:$0xff] %vm19_vm0, %v211_v1  ;;  %20 = vst.msk [vmem:[#allocation2] sm:$0xff] %vm19_vm0, %v211_v1  ;;  %v207_v2 = vld [vmem:[%s270_s1 + $0x8] sm:$0xff]  }
   0x2   :  { %21 = vst.msk [vmem:[#allocation2 + $0x8] sm:$0xff] %vm19_vm0, %v211_v1  ;;  %23 = vst.msk [vmem:[#allocation2 + $0x18] sm:$0xff] %vm19_vm0, %v211_v1  ;;  %195 = vmatprep.subr.bf16.mxu0 %v206_v0  ;;  %v209_v3 = vld [vmem:[%s271_s0] sm:$0xff]   ;;  %v208_v4 = vld [vmem:[%s270_s1 + $0x10] sm:$0xff]  }
   0x3   :  { %196 = vmatpush3.bf16.msra.mxu0 %v206_v0  ;;  %201 = vmatprep.mubr.msk.bf16.mxu0 %vm66_vm1, %v209_v3  ;;  %v210_v5 = vld [vmem:[%s271_s0 + $0x8] sm:$0xff]   ;;  %v181_v18 = vld [vmem:[%s272_s2] ss:$0 sm:$0xff] }
   0x4   :  { %197 = vmatprep.subr.bf16.mxu0 %v207_v2 }
   0x7   :  { %198 = vmatpush3.bf16.msra.mxu0 %v207_v2 }
   0x8   :  { %199 = vmatprep.subr.bf16.mxu0 %v208_v4  ;;  %v26_v6 = vld [vmem:[#allocation2 + $0x10] sm:$0xff]  ;;  %v24_v7 = vld [vmem:[#allocation2] sm:$0xff] }
   0x9   :  { %v27_v9 = vld [vmem:[#allocation2 + $0x18] sm:$0xff]  ;;  %v25_v12 = vld [vmem:[#allocation2 + $0x8] sm:$0xff] }
   0xb   :  { %200 = vmatpush3.bf16.msra.mxu0 %v208_v4 }
   0xe   :  { %202 = vmatmul.mubr.msk.bf16.vlgmr.msra.gmra.mrb[0].mxu0 %vm66_vm1, %v210_v5 }
  0xe1   :  { %v203_v8 = vpop.f32.mrb[0].mxu0 }
  0xe2   :  { %v124_v10 = vadd.f32 %v203_v8, %v26_v6  ;;  %v107_v11 = vpop.f32.mrb[1].mxu0 }
  0xe3   :  { %v122_v13 = vadd.f32 %v107_v11, %v24_v7  ;;  %v204_v14 = vpop.f32.mrb[2].mxu0 }
  0xe4   :  { %129 = vst.msk [vmem:[#allocation2 + $0x10] sm:$0xff] %vm19_vm0, %v124_v10  ;;  %v125_v15 = vadd.f32 %v204_v14, %v27_v9  ;;  %v110_v16 = vpop.f32.mrb[3].mxu0 }
  0xe5   :  { %127 = vst.msk [vmem:[#allocation2] sm:$0xff] %vm19_vm0, %v122_v13  ;;  %v123_v17 = vadd.f32 %v110_v16, %v25_v12 }
  0xe6   :  { %130 = vst.msk [vmem:[#allocation2 + $0x18] sm:$0xff] %vm19_vm0, %v125_v15 }
  0xe7   :  { %128 = vst.msk [vmem:[#allocation2 + $0x8] sm:$0xff] %vm19_vm0, %v123_v17 }
  0xeb   :  { %v136_v19 = vld [vmem:[#allocation2 + $0x10] sm:$0xff] }
  0xec   :  { %v147_v20 = vadd.f32 %v181_v18, %v136_v19  ;;  %v134_v21 = vld [vmem:[#allocation2] sm:$0xff] }
  0xed   :  { %v145_v22 = vadd.f32 %v181_v18, %v134_v21  ;;  %v137_v23 = vld [vmem:[#allocation2 + $0x18] sm:$0xff] }
  0xee   :  { %v188_v24 = vpack.c.bf16 %v147_v20, %v147_v20  ;;  %v148_v25 = vadd.f32 %v181_v18, %v137_v23  ;;  %v135_v26 = vld [vmem:[#allocation2 + $0x8] sm:$0xff] }
  0xef   :  { %v186_v27 = vpack.c.bf16 %v145_v22, %v145_v22  ;;  %v146_v28 = vadd.f32 %v181_v18, %v135_v26 }
  0xf0   :  { %168 = vst.msk [vmem:[%s273_s3 + $0x8] sm:$0xf] %vm165_vm2, %v188_v24  ;;  %v189_v29 = vpack.c.bf16 %v148_v25, %v148_v25 }
  0xf1   :  { %166 = vst.msk [vmem:[%s273_s3] sm:$0xf] %vm165_vm2, %v186_v27  ;;  %v187_v30 = vpack.c.bf16 %v146_v28, %v146_v28 }
  0xf2   :  { %169 = vst.msk [vmem:[%s273_s3 + $0xc] sm:$0xf] %vm165_vm2, %v189_v29 }
  0xf3   :  { %167 = vst.msk [vmem:[%s273_s3 + $0x4] sm:$0xf] %vm165_vm2, %v187_v30 }

// kernel: croma_forward.12
= control target key start
LH: loop header
LB: loop body
LE: loop exit
PB: predicated region body
PF: predicated region fallthrough
CT: control target
= control target key end

     0   :  { %vm26_vm0 = vcmask 523264   ;;  %v304_v38 = vmov 0   ;;  %vm235_vm1 = vcmask 1043456   ;;  %vm236_vm2 = vcmask 523268   ;;  %s408_s0 = inlined_call_operand.vmem [shape: bf16[32,64], index: 0, kind: input, shape index: {}]   ;;  %s409_s3 = inlined_call_operand.vmem [shape: bf16[64,192], index: 3, kind: input, shape index: {}]   ;;  %s410_s1 = inlined_call_operand.vmem [shape: f32[1,64], index: 1, kind: input, shape index: {}]   ;;  %s411_s2 = inlined_call_operand.vmem [shape: f32[1,64], index: 2, kind: input, shape index: {}]   ;;  %s412_s4 = inlined_call_operand.vmem [shape: bf16[32,192], index: 4, kind: output, shape index: {}]  }
   0x1   :  { %v267_v0 = vld [vmem:[%s408_s0] sm:$0xff]   ;;  %v274_v1 = vld [vmem:[%s408_s0 + $0x8] sm:$0xff]   ;;  %v287_v32 = vld [vmem:[%s409_s3 + $0x14] ss:$8 sps:$4 sm:$0xff]   ;;  %190 = vmatprep.mubr.bf16.mxu0 %v304_v38  ;;  %200 = vmatprep.mubr.bf16.mxu1 %v304_v38 }
   0x2   :  { %v268_v2 = vunpack.c.l.bf16 %v267_v0  ;;  %v272_v3 = vunpack.c.l.bf16 %v274_v1  ;;  %v269_v4 = vunpack.c.h.bf16 %v267_v0  ;;  %v273_v5 = vunpack.c.h.bf16 %v274_v1  ;;  %v284_v30 = vld [vmem:[%s409_s3 + $0x4] ss:$8 sps:$4 sm:$0xff]   ;;  %v286_v31 = vld [vmem:[%s409_s3] ss:$8 sps:$4 sm:$0xff]   ;;  %v289_v33 = vld [vmem:[%s409_s3 + $0x10] ss:$8 sps:$4 sm:$0xff]  }
   0x3   :  { %158 = vmatprep.subr.bf16.mxu0 %v284_v30  ;;  %275 = vmatprep.subr.bf16.mxu1 %v284_v30  ;;  %v290_v34 = vld [vmem:[%s409_s3 + $0x24] ss:$8 sps:$4 sm:$0xff]   ;;  %v292_v35 = vld [vmem:[%s409_s3 + $0x20] ss:$8 sps:$4 sm:$0xff]   ;;  %v293_v36 = vld [vmem:[%s409_s3 + $0x34] ss:$8 sps:$4 sm:$0xff]  }
   0x4   :  { %v27_v6 = vsel %vm26_vm0, %v268_v2, 0.0  ;;  %v33_v7 = vsel %vm26_vm0, %v272_v3, 0.0  ;;  %v30_v8 = vsel %vm26_vm0, %v269_v4, 0.0  ;;  %v36_v9 = vsel %vm26_vm0, %v273_v5, 0.0  ;;  %159 = vmatpush1.bf16.msra.mxu0 %v286_v31  ;;  %279 = vmatpush1.bf16.msra.mxu1 %v286_v31  ;;  %v295_v37 = vld [vmem:[%s409_s3 + $0x30] ss:$8 sps:$4 sm:$0xff]   ;;  %vm237_vm3 = vmor %vm236_vm2, %vm235_vm1 }
   0x5   :  { %28 = vadd.xlane.f32.xlu0 %v27_v6  ;;  %34 = vadd.xlane.f32.xlu1 %v33_v7  ;;  %v246_v53 = vld [vmem:[%s410_s1] ss:$0 sm:$0xff] }
   0x6   :  { %160 = vmatprep.subr.bf16.mxu0 %v287_v32  ;;  %276 = vmatprep.subr.bf16.mxu1 %v287_v32  ;;  %v247_v59 = vld [vmem:[%s411_s2] ss:$0 sm:$0xff] }
   0x8   :  { %161 = vmatpush1.bf16.msra.mxu0 %v289_v33  ;;  %280 = vmatpush1.bf16.msra.mxu1 %v289_v33 }
   0x9   :  { %31 = vadd.xlane.f32.xlu0 %v30_v8  ;;  %37 = vadd.xlane.f32.xlu1 %v36_v9 }
   0xa   :  { %162 = vmatprep.subr.bf16.mxu0 %v290_v34  ;;  %277 = vmatprep.subr.bf16.mxu1 %v290_v34 }
   0xc   :  { %163 = vmatpush1.bf16.msra.mxu0 %v292_v35  ;;  %281 = vmatpush1.bf16.msra.mxu1 %v292_v35 }
   0xd   :  { %164 = vmatprep.subr.bf16.mxu0 %v293_v36  ;;  %278 = vmatprep.subr.bf16.mxu1 %v293_v36 }
  0x10   :  { %165 = vmatpush1.bf16.msra.mxu0 %v295_v37  ;;  %282 = vmatpush1.bf16.msra.mxu1 %v295_v37 }
  0x92   :  { %v29_v10 = vpop.xlane.xlu0 %28  ;;  %v35_v11 = vpop.xlane.xlu1 %34 }
  0x93   :  { %v40_v12 = vmul.f32 0.015625, %v29_v10  ;;  %v42_v13 = vmul.f32 0.015625, %v35_v11 }
  0x95   :  { %v340_v14 = vsub.f32 %v268_v2, %v40_v12  ;;  %v342_v15 = vsub.f32 %v272_v3, %v42_v13 }
  0x96   :  { %v32_v16 = vpop.xlane.xlu0 %31  ;;  %v38_v17 = vpop.xlane.xlu1 %37 }
  0x97   :  { %v41_v18 = vmul.f32 0.015625, %v32_v16  ;;  %v43_v19 = vmul.f32 0.015625, %v38_v17  ;;  %v48_v20 = vmul.f32 %v340_v14, %v340_v14  ;;  %v50_v21 = vmul.f32 %v342_v15, %v342_v15 }
  0x99   :  { %v348_v22 = vsub.f32 %v269_v4, %v41_v18  ;;  %v350_v23 = vsub.f32 %v273_v5, %v43_v19  ;;  %v52_v24 = vsel %vm26_vm0, %v48_v20, 0.0  ;;  %v58_v25 = vsel %vm26_vm0, %v50_v21, 0.0 }
  0x9a   :  { %53 = vadd.xlane.f32.xlu0 %v52_v24 }
  0x9b   :  { %v49_v26 = vmul.f32 %v348_v22, %v348_v22  ;;  %v51_v27 = vmul.f32 %v350_v23, %v350_v23 }
  0x9d   :  { %v55_v28 = vsel %vm26_vm0, %v49_v26, 0.0  ;;  %v61_v29 = vsel %vm26_vm0, %v51_v27, 0.0 }
  0x9e   :  { %59 = vadd.xlane.f32.xlu0 %v58_v25  ;;  %56 = vadd.xlane.f32.xlu1 %v55_v28 }
  0xa2   :  { %62 = vadd.xlane.f32.xlu1 %v61_v29 }
 0x127   :  { %v54_v39 = vpop.xlane.xlu0 %53 }
 0x128   :  { %v64_v40 = vmul.f32 0.015625, %v54_v39 }
 0x12a   :  { %v68_v41 = vadd.f32 1e-05, %v64_v40 }
 0x12b   :  { %v57_v42 = vpop.xlane.xlu1 %56  ;;  %v60_v43 = vpop.xlane.xlu0 %59 }
 0x12c   :  { %296 = vrsqrt.f32 %v68_v41  ;;  %v65_v44 = vmul.f32 0.015625, %v57_v42  ;;  %v66_v45 = vmul.f32 0.015625, %v60_v43 }
 0x12e   :  { %v69_v46 = vadd.f32 1e-05, %v65_v44  ;;  %v70_v47 = vadd.f32 1e-05, %v66_v45 }
 0x12f   :  { %v63_v48 = vpop.xlane.xlu1 %62 }
 0x130   :  { %298 = vrsqrt.f32 %v69_v46  ;;  %v67_v49 = vmul.f32 0.015625, %v63_v48 }
 0x131   :  { %300 = vrsqrt.f32 %v70_v47 }
 0x132   :  { %v71_v50 = vadd.f32 1e-05, %v67_v49 }
 0x134   :  { %302 = vrsqrt.f32 %v71_v50 }
 0x136   :  { %v297_v51 = vpop.eup %296 }
 0x137   :  { %v76_v52 = vmul.f32 %v297_v51, %v340_v14 }
 0x139   :  { %v87_v57 = vmul.f32 %v246_v53, %v76_v52 }
 0x13a   :  { %v299_v54 = vpop.eup %298 }
 0x13b   :  { %v301_v55 = vpop.eup %300  ;;  %v77_v56 = vmul.f32 %v299_v54, %v348_v22  ;;  %v98_v63 = vadd.f32 %v247_v59, %v87_v57 }
 0x13c   :  { %v78_v58 = vmul.f32 %v301_v55, %v342_v15 }
 0x13d   :  { %v88_v60 = vmul.f32 %v246_v53, %v77_v56 }
 0x13e   :  { %v303_v61 = vpop.eup %302  ;;  %v89_v1 = vmul.f32 %v246_v53, %v78_v58 }
 0x13f   :  { %v79_v62 = vmul.f32 %v303_v61, %v350_v23  ;;  %v99_v0 = vadd.f32 %v247_v59, %v88_v60 }
 0x140   :  { %v100_v4 = vadd.f32 %v247_v59, %v89_v1 }
 0x141   :  { %v102_v2 = vpack.c.bf16 %v99_v0, %v98_v63  ;;  %v90_v3 = vmul.f32 %v246_v53, %v79_v62 }
 0x143   :  { %256 = vmatmul.mubr.msk.bf16.vlgmr.msra.gmra.mrb[0].mxu0 %vm26_vm0, %v102_v2  ;;  %v101_v5 = vadd.f32 %v247_v59, %v90_v3 }
 0x145   :  { %v103_v6 = vpack.c.bf16 %v101_v5, %v100_v4 }
 0x147   :  { %257 = vmatmul.mubr.msk.bf16.vlgmr.msra.gmra.mrb[0].mxu1 %vm26_vm0, %v103_v6 }
 0x216   :  { %v192_v7 = vpop.f32.mrb[0].mxu0 }
 0x217   :  { %v194_v8 = vpop.f32.mrb[1].mxu0 }
 0x218   :  { %v262_v9 = vpack.c.bf16 %v194_v8, %v192_v7  ;;  %v196_v10 = vpop.f32.mrb[2].mxu0 }
 0x219   :  { %v198_v11 = vpop.f32.mrb[3].mxu0 }
 0x21a   :  { %238 = vst.msk [vmem:[%s412_s4] sm:$0xff] %vm237_vm3, %v262_v9  ;;  %v263_v12 = vpack.c.bf16 %v198_v11, %v196_v10  ;;  %v202_v13 = vpop.f32.mrb[0].mxu1 }
 0x21b   :  { %v204_v14 = vpop.f32.mrb[1].mxu1 }
 0x21c   :  { %239 = vst.msk [vmem:[%s412_s4 + $0x8] sm:$0xff] %vm237_vm3, %v263_v12  ;;  %v264_v15 = vpack.c.bf16 %v204_v14, %v202_v13  ;;  %v206_v16 = vpop.f32.mrb[2].mxu1 }
 0x21d   :  { %v208_v17 = vpop.f32.mrb[3].mxu1 }
 0x21e   :  { %240 = vst.msk [vmem:[%s412_s4 + $0x10] sm:$0xff] %vm237_vm3, %v264_v15  ;;  %v265_v18 = vpack.c.bf16 %v208_v17, %v206_v16 }
 0x220   :  { %241 = vst.msk [vmem:[%s412_s4 + $0x18] sm:$0xff] %vm237_vm3, %v265_v18 }

// kernel: croma_forward.13
= control target key start
LH: loop header
LB: loop body
LE: loop exit
PB: predicated region body
PF: predicated region fallthrough
CT: control target
= control target key end

     0   :  { %s1368_s18 = smov 0   ;;  %s1516_s0 = inlined_call_operand.vmem [shape: bf16[2,16,192], index: 0, kind: input, shape index: {}]   ;;  %s1517_s1 = inlined_call_operand.vmem [shape: f32[2,16,16], index: 1, kind: input, shape index: {}]   ;;  %s1518_s2 = inlined_call_operand.vmem [shape: bf16[64,64], index: 2, kind: input, shape index: {}]   ;;  %s1519_s3 = inlined_call_operand.vmem [shape: f32[1,64], index: 3, kind: input, shape index: {}]   ;;  %s1520_s4 = inlined_call_operand.vmem [shape: bf16[2,16,64], index: 4, kind: input, shape index: {}]   ;;  %s1521_s5 = inlined_call_operand.vmem [shape: bf16[2,16,64], index: 5, kind: output, shape index: {}]  }
   0x1 LB: > { %s1110_s19 = sadd.s32 4294967295, %s1327_s18   ;;  %p1114_p0 = scmp.ge.s32.totalorder %s1327_s18, 1  ;;  %s1327_s18 = sphi %s1368_s18, %s15_s18  }
   0x2   : > { %p207_p1 = scmp.lt.s32.totalorder %s1327_s18, 3 }
   0x4   : > { %p208_p2 = pnand %p1114_p0, %p207_p1 }
   0x5   : > { %p245_p3 = scmp.lt.s32.totalorder (!%p208_p2), %s1110_s19, 1  ;;  %v1329_v0 = vmov (!%p208_p2), 0.0   ;;  %vm1330_vm0 = vmmov (!%p208_p2), 0   ;;  %s1331_s24 = smov (!%p208_p2), 64   ;;  %vm292_vm1 = vcmask (!%p208_p2), 130048   ;;  %v1285_v42 = vld [vmem:[%s1518_s2] sm:$0xff] (!%p208_p2)  }
   0x6   : > { %211 = sbr.rel (%p208_p2) target bundleno = 2207 (0x89f), region = 40  ;;  %1180 = vmatprep.subr.bf16.mxu0 (!%p208_p2), %v1329_v0  ;;  %1182 = vmatprep.mubr.msk.bf16.mxu0 (!%p208_p2), %vm1330_vm0, %v1329_v0  ;;  %s1332_s28 = smov (!%p208_p2), 48   ;;  %vm1028_vm2 = vcmask (!%p208_p2), 519168  }
   0x7   : > { %1192 = vmatprep.subr.bf16.mxu1 (!%p208_p2), %v1329_v0  ;;  %1194 = vmatprep.mubr.msk.bf16.mxu1 (!%p208_p2), %vm1330_vm0, %v1329_v0  ;;  %s1333_s29 = smov (!%p208_p2), 96   ;;  %s1334_s30 = smov (!%p208_p2), 112  }
   0x8   : > { %s1335_s6 = smov (!%p208_p2), 32   ;;  %1193 = vmatpush3.bf16.msra.mxu1 (!%p208_p2), %v1285_v42  ;;  %s1336_s9 = smov (!%p208_p2), 16  }
   0x9   : > { %1204 = vmatprep.subr.bf16.mxu1 (!%p208_p2), %v1329_v0  ;;  %s1337_s10 = smov (!%p208_p2), 80  }
   0xd   : > { %s1523_s19 = smov (!%p245_p3, %s1110_s19), 1 }
   0xe   : > { %s1146_s20 = sshll.u32 %s1523_s19, 4  ;;  %s1148_s17 = sshll.u32 %s1523_s19, 3 }
   0xf   : > { %s1388_s23 = scalar_lea.vmem %s1516_s0, %s1146_s20  ;;  %s254_s27 = scalar_lea.vmem %s1517_s1, %s1146_s20 }
  0x10   : > { %v1391_v1 = vld [vmem:[%s1388_s23] ss:$8 sps:$4 sm:$0xff]   ;;  %v1419_v28 = vld [vmem:[%s1388_s23 + $0x4] ss:$8 sps:$4 sm:$0xff]   ;;  %s259_s22 = scalar_lea.vmem %s1520_s4, %s1148_s17  ;;  %s264_s19 = scalar_lea.vmem %s1521_s5, %s1148_s17 }
  0x11   : > { %290 = vrot.lane.b32.xlu0 %v1391_v1, %s1331_s24  ;;  %v1403_v4 = vld [vmem:[%s254_s27] sm:$0xff]  ;;  %v1405_v5 = vld [vmem:[%s254_s27 + $0x8] sm:$0xff] }
  0x12   : > { %v342_v6 = vmul.f32 0.25, %v1403_v4  ;;  %v343_v10 = vmul.f32 0.25, %v1405_v5  ;;  %v709_v52 = vmul.f32 0.015625, %v1403_v4  ;;  %v710_v56 = vmul.f32 0.015625, %v1405_v5 }
  0x83   : > { %v291_v2 = vpop.permute.xlu0 %290 }
  0x84   : > { %v297_v3 = vsel %vm292_vm1, %v291_v2, 0 }
  0x85   : > { %1181 = vmatpush3.bf16.xpose.msra.mxu0 %v297_v3  ;;  %v528_v3 = vmul.f32 0.0625, %v1405_v5 }
  0x86   : > { %1186 = vmatprep.subr.bf16.mxu0 %v1329_v0 }
  0x8c   : > { %1183 = vmatmul.mubr.msk.bf16.vlgmr.msra.gmra.mrb[0].mxu0 %vm292_vm1, %v1391_v1 }
  0x8d   : > { %1188 = vmatprep.mubr.msk.bf16.mxu0 %vm1330_vm0, %v1329_v0  ;;  %1187 = vmatpush3.bf16.msra.mxu0 %v1419_v28 }
  0x8e   : > { %1198 = vmatprep.subr.bf16.mxu0 %v1329_v0 }
 0x15f   : > { %v333_v7 = vpop.f32.mrb[0].mxu0 }
 0x160   : > { %v340_v8 = vmul.f32 0.25, %v333_v7  ;;  %v1184_v9 = vpop.f32.mrb[1].mxu0 }
 0x161   : > { %v336_v11 = vpop.f32.mrb[2].mxu0 }
 0x162   : > { %v341_v12 = vmul.f32 0.25, %v336_v11  ;;  %v1185_v13 = vpop.f32.mrb[3].mxu0  ;;  %v344_v14 = vsub.f32 %v340_v8, %v342_v6 }
 0x164   : > { %v346_v15 = vsel %vm292_vm1, %v344_v14, -inf  ;;  %v345_v16 = vsub.f32 %v341_v12, %v343_v10 }
 0x165   : > { %347 = vmax.xlane.f32.xlu0 %v346_v15 }
 0x166   : > { %v349_v17 = vsel %vm292_vm1, %v345_v16, -inf }
 0x167   : > { %350 = vmax.xlane.f32.xlu1 %v349_v17 }
 0x178   : > { %476 = vrot.lane.b32.xlu1 %v1391_v1, %s1332_s28 }
 0x17b   : > { %656 = vrot.lane.b32.xlu0 %v1391_v1, %s1333_s29 }
 0x1f2   : > { %v348_v18 = vpop.xlane.xlu0 %347 }
 0x1f3   : > { %v352_v19 = vsub.f32 %v344_v14, %v348_v18 }
 0x1f4   : > { %v351_v20 = vpop.xlane.xlu1 %350 }
 0x1f5   : > { %v354_v21 = vmul.f32 1.442695, %v352_v19  ;;  %v353_v22 = vsub.f32 %v345_v16, %v351_v20 }
 0x1f6   : > { %v657_v41 = vpop.permute.xlu0 %656 }
 0x1f7   : > { %1289 = vpow2.f32 %v354_v21  ;;  %v356_v23 = vmul.f32 1.442695, %v353_v22 }
 0x1f8   : > { %v477_v29 = vpop.permute.xlu1 %476 }
 0x1f9   : > { %1291 = vpow2.f32 %v356_v23  ;;  %v482_v38 = vsel %vm292_vm1, %v477_v29, 0  ;;  %v527_v23 = vmul.f32 0.0625, %v1403_v4 }
 0x201   : > { %v1290_v24 = vpop.eup %1289 }
 0x202   : > { %v358_v25 = vsel %vm292_vm1, %v1290_v24, 0.0 }
 0x203   : > { %v1292_v26 = vpop.eup %1291  ;;  %359 = vadd.xlane.f32.xlu1 %v358_v25 }
 0x204   : > { %v361_v27 = vsel %vm292_vm1, %v1292_v26, 0.0 }
 0x207   : > { %362 = vadd.xlane.f32.xlu1 %v361_v27 }
 0x218   : > { %474 = vrot.lane.b32.xlu1 %v1391_v1, %s1334_s30 }
 0x21c   : > { %658 = vrot.lane.b32.xlu1 %v1391_v1, %s1335_s6 }
 0x290   : > { %v360_v30 = vpop.xlane.xlu1 %359 }
 0x291   : > { %1293 = vrcp.f32 %v360_v30 }
 0x294   : > { %v363_v31 = vpop.xlane.xlu1 %362 }
 0x295   : > { %1295 = vrcp.f32 %v363_v31 }
 0x298   : > { %v475_v36 = vpop.permute.xlu1 %474 }
 0x29b   : > { %v1294_v32 = vpop.eup %1293 }
 0x29c   : > { %v366_v34 = vmul.f32 %v1294_v32, %v1290_v24  ;;  %v659_v39 = vpop.permute.xlu1 %658 }
 0x29d   : > { %v664_v40 = vsel %vm292_vm1, %v659_v39, 0 }
 0x29f   : > { %v1296_v33 = vpop.eup %1295 }
 0x2a0   : > { %v367_v35 = vmul.f32 %v1296_v33, %v1292_v26 }
 0x2a2   : > { %v368_v37 = vpack.c.bf16 %v367_v35, %v366_v34 }
 0x2a4   : > { %1189 = vmatmul.mubr.msk.bf16.vlgmr.msra.gmra.mrb[4].mxu0 %vm292_vm1, %v368_v37 }
 0x2a5   : > { %1199 = vmatpush3.bf16.xpose.msra.mxu0 %v482_v38  ;;  %1200 = vmatprep.mubr.msk.bf16.mxu0 %vm1330_vm0, %v1329_v0 }
 0x2a6   : > { %1216 = vmatprep.subr.bf16.mxu0 %v1329_v0 }
 0x2ac   : > { %1201 = vmatmul.mubr.msk.bf16.vlgmr.msra.gmra.mrb[8].mxu0 %vm292_vm1, %v475_v36 }
 0x2ad   : > { %1217 = vmatpush3.bf16.xpose.msra.mxu0 %v664_v40  ;;  %1218 = vmatprep.mubr.msk.bf16.mxu0 %vm1330_vm0, %v1329_v0 }
 0x2ae   : > { %1222 = vmatprep.subr.bf16.mxu0 %v1329_v0 }
 0x2b4   : > { %1219 = vmatmul.mubr.msk.bf16.vlgmr.msra.gmra.mrb[12].mxu0 %vm292_vm1, %v657_v41 }
 0x2b5   : > { %1224 = vmatprep.mubr.msk.bf16.mxu0 %vm1330_vm0, %v1329_v0 }
 0x377   : > { %v412_v43 = vpop.f32.mrb[4].mxu0 }
 0x378   : > { %v1190_v44 = vpop.f32.mrb[5].mxu0 }
 0x379   : > { %v415_v45 = vpop.f32.mrb[6].mxu0 }
 0x37a   : > { %v419_v46 = vpack.c.bf16 %v415_v45, %v412_v43  ;;  %v1191_v47 = vpop.f32.mrb[7].mxu0 }
 0x37c   : > { %1195 = vmatmul.mubr.msk.bf16.vlgmr.msra.gmra.mrb[0].mxu1 %vm292_vm1, %v419_v46 }
 0x37d   : > { %1206 = vmatprep.mubr.msk.bf16.mxu1 %vm1330_vm0, %v1329_v0 }
 0x37f   : > { %v518_v48 = vpop.f32.mrb[8].mxu0 }
 0x380   : > { %v1202_v49 = vpop.f32.mrb[9].mxu0  ;;  %v525_v22 = vmul.f32 0.25, %v518_v48 }
 0x381   : > { %v521_v50 = vpop.f32.mrb[10].mxu0 }
 0x382   : > { %v1203_v51 = vpop.f32.mrb[11].mxu0  ;;  %v526_v2 = vmul.f32 0.25, %v521_v50  ;;  %v529_v26 = vsub.f32 %v525_v22, %v527_v23 }
 0x384   : > { %v530_v6 = vsub.f32 %v526_v2, %v528_v3  ;;  %v531_v27 = vsel %vm292_vm1, %v529_v26, -inf }
 0x386   : > { %v534_v7 = vsel %vm292_vm1, %v530_v6, -inf }
 0x387   : > { %v700_v53 = vpop.f32.mrb[12].mxu0 }
 0x388   : > { %v707_v54 = vmul.f32 0.25, %v700_v53  ;;  %v1220_v55 = vpop.f32.mrb[13].mxu0 }
 0x389   : > { %v703_v57 = vpop.f32.mrb[14].mxu0 }
 0x38a   : > { %v708_v58 = vmul.f32 0.25, %v703_v57  ;;  %v1221_v59 = vpop.f32.mrb[15].mxu0  ;;  %v711_v60 = vsub.f32 %v707_v54, %v709_v52 }
 0x38b   : > { %v892_v59 = vmul.f32 0.00390625, %v1405_v5 }
 0x38c   : > { %v713_v61 = vsel %vm292_vm1, %v711_v60, -inf  ;;  %v712_v62 = vsub.f32 %v708_v58, %v710_v56 }
 0x38d   : > { %714 = vmax.xlane.f32.xlu1 %v713_v61 }
 0x38e   : > { %v716_v63 = vsel %vm292_vm1, %v712_v62, -inf }
 0x38f   : > { %717 = vmax.xlane.f32.xlu0 %v716_v63 }
 0x3a5   : > { %840 = vrot.lane.b32.xlu0 %v1391_v1, %s1336_s9 }
 0x3c4   : > { %535 = vmax.xlane.f32.xlu0 %v534_v7 }
 0x41a   : > { %v715_v8 = vpop.xlane.xlu1 %714 }
 0x41b   : > { %v719_v9 = vsub.f32 %v711_v60, %v715_v8 }
 0x41c   : > { %v718_v10 = vpop.xlane.xlu0 %717 }
 0x41d   : > { %v721_v11 = vmul.f32 1.442695, %v719_v9  ;;  %v720_v12 = vsub.f32 %v712_v62, %v718_v10 }
 0x41f   : > { %1297 = vpow2.f32 %v721_v11  ;;  %v723_v13 = vmul.f32 1.442695, %v720_v12 }
 0x420   : > { %v841_v18 = vpop.permute.xlu0 %840 }
 0x421   : > { %1299 = vpow2.f32 %v723_v13  ;;  %v846_v35 = vsel %vm292_vm1, %v841_v18, 0 }
 0x429   : > { %v1298_v14 = vpop.eup %1297 }
 0x42a   : > { %v725_v15 = vsel %vm292_vm1, %v1298_v14, 0.0 }
 0x42b   : > { %v1300_v16 = vpop.eup %1299  ;;  %726 = vadd.xlane.f32.xlu1 %v725_v15 }
 0x42c   : > { %v728_v17 = vsel %vm292_vm1, %v1300_v16, 0.0 }
 0x42f   : > { %729 = vadd.xlane.f32.xlu1 %v728_v17 }
 0x440   : > { %736 = vrot.lane.b32.xlu1 %v1419_v28, %s1333_s29 }
 0x444   : > { %838 = vrot.lane.b32.xlu1 %v1391_v1, %s1337_s10 }
 0x451   : > { %v536_v19 = vpop.xlane.xlu0 %535 }
 0x452   : > { %v538_v20 = vsub.f32 %v530_v6, %v536_v19  ;;  %v1287_v19 = vld [vmem:[%s1518_s2 + $0x10] sm:$0xff]  }
 0x454   : > { %v541_v21 = vmul.f32 1.442695, %v538_v20 }
 0x456   : > { %1301 = vpow2.f32 %v541_v21 }
 0x460   : > { %v1302_v24 = vpop.eup %1301 }
 0x461   : > { %v546_v25 = vsel %vm292_vm1, %v1302_v24, 0.0 }
 0x462   : > { %547 = vadd.xlane.f32.xlu0 %v546_v25 }
 0x468   : > { %532 = vmax.xlane.f32.xlu1 %v531_v27 }
 0x4b8   : > { %v727_v29 = vpop.xlane.xlu1 %726 }
 0x4b9   : > { %1303 = vrcp.f32 %v727_v29 }
 0x4bc   : > { %v730_v30 = vpop.xlane.xlu1 %729 }
 0x4bd   : > { %1305 = vrcp.f32 %v730_v30  ;;  %v1288_v30 = vld [vmem:[%s1518_s2 + $0x18] sm:$0xff]  }
 0x4c0   : > { %v737_v1 = vpop.permute.xlu1 %736 }
 0x4c1   : > { %1223 = vmatpush3.bf16.msra.mxu0 %v737_v1 }
 0x4c2   : > { %1234 = vmatprep.subr.bf16.mxu0 %v1329_v0 }
 0x4c3   : > { %v1304_v31 = vpop.eup %1303 }
 0x4c4   : > { %v733_v33 = vmul.f32 %v1304_v31, %v1298_v14  ;;  %v839_v37 = vpop.permute.xlu1 %838 }
 0x4c7   : > { %v1306_v32 = vpop.eup %1305 }
 0x4c8   : > { %v734_v34 = vmul.f32 %v1306_v32, %v1300_v16 }
 0x4ca   : > { %v735_v36 = vpack.c.bf16 %v734_v34, %v733_v33 }
 0x4cc   : > { %1225 = vmatmul.mubr.msk.bf16.vlgmr.msra.gmra.mrb[16].mxu0 %vm292_vm1, %v735_v36  ;;  %v1153_v36 = vld [vmem:[%s259_s22] sm:$0xff]  }
 0x4cd   : > { %1235 = vmatpush3.bf16.xpose.msra.mxu0 %v846_v35  ;;  %1236 = vmatprep.mubr.msk.bf16.mxu0 %vm1330_vm0, %v1329_v0 }
 0x4d4   : > { %1237 = vmatmul.mubr.msk.bf16.vlgmr.msra.gmra.mrb[20].mxu0 %vm292_vm1, %v839_v37  ;;  %v1154_v37 = vunpack.c.l.bf16 %v1153_v36 }
 0x4ef   : > { %v548_v43 = vpop.xlane.xlu0 %547 }
 0x4f5   : > { %v533_v38 = vpop.xlane.xlu1 %532 }
 0x4f6   : > { %v537_v39 = vsub.f32 %v529_v26, %v533_v38  ;;  %v1123_v38 = vld [vmem:[%s1519_s3] ss:$0 sm:$0xff] }
 0x4f8   : > { %v539_v40 = vmul.f32 1.442695, %v537_v39  ;;  %v1155_v39 = vunpack.c.h.bf16 %v1153_v36 }
 0x4fa   : > { %1307 = vpow2.f32 %v539_v40  ;;  %v280_v40 = vadd.f32 %v1155_v39, %v1123_v38 }
 0x4fb   : > { %1309 = vrcp.f32 %v548_v43 }
 0x504   : > { %v1308_v41 = vpop.eup %1307 }
 0x505   : > { %v543_v42 = vsel %vm292_vm1, %v1308_v41, 0.0  ;;  %v1310_v46 = vpop.eup %1309 }
 0x506   : > { %544 = vadd.xlane.f32.xlu1 %v543_v42  ;;  %v552_v48 = vmul.f32 %v1310_v46, %v1302_v24 }
 0x517   : > { %554 = vrot.lane.b32.xlu1 %v1419_v28, %s1334_s30 }
 0x51b   : > { %918 = vrot.lane.b32.xlu1 %v1419_v28, %s1337_s10  ;;  %v891_v28 = vmul.f32 0.00390625, %v1403_v4  ;;  %v1286_v4 = vld [vmem:[%s1518_s2 + $0x8] sm:$0xff]  }
 0x593   : > { %v545_v44 = vpop.xlane.xlu1 %544 }
 0x594   : > { %1311 = vrcp.f32 %v545_v44 }
 0x597   : > { %v555_v45 = vpop.permute.xlu1 %554 }
 0x598   : > { %1205 = vmatpush3.bf16.msra.mxu1 %v555_v45 }
 0x599   : > { %1210 = vmatprep.subr.bf16.mxu1 %v1329_v0 }
 0x59b   : > { %v919_v22 = vpop.permute.xlu1 %918 }
 0x59e   : > { %v1312_v47 = vpop.eup %1311 }
 0x59f   : > { %v551_v49 = vmul.f32 %v1312_v47, %v1308_v41  ;;  %v776_v50 = vpop.f32.mrb[16].mxu0 }
 0x5a0   : > { %v1226_v51 = vpop.f32.mrb[17].mxu0 }
 0x5a1   : > { %v779_v52 = vpop.f32.mrb[18].mxu0  ;;  %v553_v53 = vpack.c.bf16 %v552_v48, %v551_v49 }
 0x5a2   : > { %v783_v54 = vpack.c.bf16 %v779_v52, %v776_v50  ;;  %v1227_v55 = vpop.f32.mrb[19].mxu0 }
 0x5a3   : > { %1207 = vmatmul.mubr.msk.bf16.vlgmr.msra.gmra.mrb[4].mxu1 %vm292_vm1, %v553_v53 }
 0x5a4   : > { %1212 = vmatprep.mubr.msk.bf16.mxu1 %vm1330_vm0, %v1329_v0  ;;  %1211 = vmatpush3.bf16.msra.mxu1 %v1286_v4 }
 0x5a5   : > { %1228 = vmatprep.subr.bf16.mxu1 %v1329_v0 }
 0x5a7   : > { %v882_v56 = vpop.f32.mrb[20].mxu0 }
 0x5a8   : > { %v889_v57 = vmul.f32 0.25, %v882_v56  ;;  %v1238_v58 = vpop.f32.mrb[21].mxu0 }
 0x5a9   : > { %v885_v60 = vpop.f32.mrb[22].mxu0 }
 0x5aa   : > { %v890_v61 = vmul.f32 0.25, %v885_v60  ;;  %v1239_v62 = vpop.f32.mrb[23].mxu0  ;;  %v893_v63 = vsub.f32 %v889_v57, %v891_v28 }
 0x5ac   : > { %v895_v2 = vsel %vm292_vm1, %v893_v63, -inf  ;;  %v894_v3 = vsub.f32 %v890_v61, %v892_v59 }
 0x5ad   : > { %896 = vmax.xlane.f32.xlu0 %v895_v2 }
 0x5ae   : > { %v898_v6 = vsel %vm292_vm1, %v894_v3, -inf }
 0x5b1   : > { %899 = vmax.xlane.f32.xlu0 %v898_v6 }
 0x63a   : > { %v897_v7 = vpop.xlane.xlu0 %896 }
 0x63b   : > { %v901_v5 = vsub.f32 %v893_v63, %v897_v7 }
 0x63d   : > { %v903_v8 = vmul.f32 1.442695, %v901_v5 }
 0x63e   : > { %v900_v9 = vpop.xlane.xlu0 %899 }
 0x63f   : > { %1313 = vpow2.f32 %v903_v8  ;;  %v902_v10 = vsub.f32 %v894_v3, %v900_v9 }
 0x641   : > { %v905_v11 = vmul.f32 1.442695, %v902_v10 }
 0x643   : > { %1315 = vpow2.f32 %v905_v11 }
 0x649   : > { %v1314_v12 = vpop.eup %1313 }
 0x64a   : > { %v907_v13 = vsel %vm292_vm1, %v1314_v12, 0.0 }
 0x64b   : > { %908 = vadd.xlane.f32.xlu0 %v907_v13 }
 0x64d   : > { %v1316_v14 = vpop.eup %1315 }
 0x64e   : > { %v910_v15 = vsel %vm292_vm1, %v1316_v14, 0.0 }
 0x64f   : > { %911 = vadd.xlane.f32.xlu0 %v910_v15 }
 0x676   : > { %v594_v16 = vpop.f32.mrb[4].mxu1 }
 0x677   : > { %v1208_v17 = vpop.f32.mrb[5].mxu1 }
 0x678   : > { %v597_v18 = vpop.f32.mrb[6].mxu1 }
 0x679   : > { %v601_v20 = vpack.c.bf16 %v597_v18, %v594_v16  ;;  %v1209_v21 = vpop.f32.mrb[7].mxu1 }
 0x67b   : > { %1213 = vmatmul.mubr.msk.bf16.vlgmr.msra.gmra.mrb[0].mxu1 %vm292_vm1, %v601_v20 }
 0x67c   : > { %1229 = vmatpush3.bf16.msra.mxu1 %v1287_v19  ;;  %1230 = vmatprep.mubr.msk.bf16.mxu1 %vm1330_vm0, %v1329_v0 }
 0x67d   : > { %1240 = vmatprep.subr.bf16.mxu1 %v1329_v0 }
 0x687   : > { %1231 = vmatmul.mubr.msk.bf16.vlgmr.msra.gmra.mrb[0].mxu1 %vm292_vm1, %v783_v54 }
 0x688   : > { %1241 = vmatpush3.bf16.msra.mxu1 %v919_v22  ;;  %1242 = vmatprep.mubr.msk.bf16.mxu1 %vm1330_vm0, %v1329_v0 }
 0x689   : > { %1246 = vmatprep.subr.bf16.mxu1 %v1329_v0 }
 0x6d8   : > { %v909_v23 = vpop.xlane.xlu0 %908 }
 0x6d9   : > { %1317 = vrcp.f32 %v909_v23 }
 0x6dc   : > { %v912_v24 = vpop.xlane.xlu0 %911 }
 0x6dd   : > { %1319 = vrcp.f32 %v912_v24 }
 0x6e3   : > { %v1318_v25 = vpop.eup %1317 }
 0x6e4   : > { %v915_v27 = vmul.f32 %v1318_v25, %v1314_v12 }
 0x6e7   : > { %v1320_v26 = vpop.eup %1319 }
 0x6e8   : > { %v916_v29 = vmul.f32 %v1320_v26, %v1316_v14 }
 0x6ea   : > { %v917_v1 = vpack.c.bf16 %v916_v29, %v915_v27 }
 0x6ec   : > { %1243 = vmatmul.mubr.msk.bf16.vlgmr.msra.gmra.mrb[8].mxu1 %vm292_vm1, %v917_v1 }
 0x6ed   : > { %1247 = vmatpush3.bf16.msra.mxu1 %v1288_v30  ;;  %1248 = vmatprep.mubr.msk.bf16.mxu1 %vm1330_vm0, %v1329_v0  ;;  %v279_v0 = vadd.f32 %v1154_v37, %v1123_v38 }
 0x7bf   : > { %v958_v31 = vpop.f32.mrb[8].mxu1 }
 0x7c0   : > { %v1244_v32 = vpop.f32.mrb[9].mxu1 }
 0x7c1   : > { %v961_v33 = vpop.f32.mrb[10].mxu1 }
 0x7c2   : > { %v965_v34 = vpack.c.bf16 %v961_v33, %v958_v31  ;;  %v1245_v35 = vpop.f32.mrb[11].mxu1 }
 0x7c4   : > { %1249 = vmatmul.mubr.msk.bf16.vlgmr.msra.gmra.mrb[0].mxu1 %vm292_vm1, %v965_v34 }
 0x897   : > { %v1011_v41 = vpop.f32.mrb[0].mxu1 }
 0x898   : > { %v1252_v42 = vadd.f32 %v1011_v41, %v279_v0  ;;  %v1250_v43 = vpop.f32.mrb[1].mxu1 }
 0x899   : > { %v1014_v44 = vpop.f32.mrb[2].mxu1 }
 0x89a   : > { %v1150_v45 = vpack.c.bf16 %v1252_v42, %v1252_v42  ;;  %v1253_v46 = vadd.f32 %v1014_v44, %v280_v40  ;;  %v1251_v47 = vpop.f32.mrb[3].mxu1 }
 0x89c   : > { %1029 = vst.msk [vmem:[%s264_s19] sm:$0xf] %vm1028_vm2, %v1150_v45  ;;  %v1151_v48 = vpack.c.bf16 %v1253_v46, %v1253_v46 }
 0x89e   : > { %1030 = vst.msk [vmem:[%s264_s19 + $0x4] sm:$0xf] %vm1028_vm2, %v1151_v48 }
 0x89f PF: > { %s15_s18 = sadd.s32 1, %s1327_s18  }
 0x8a0   : > { %p12_p4 = scmp.ge.s32.totalorder %s15_s18, 4  }
 0x8a2   :  { %14 = sbr.rel (!%p12_p4) target bundleno = 1 (0x1), region = 76 }

// kernel: croma_forward.14
= control target key start
LH: loop header
LB: loop body
LE: loop exit
PB: predicated region body
PF: predicated region fallthrough
CT: control target
= control target key end

     0   :  { %vm29_vm0 = vcmask 523264   ;;  %v404_v38 = vmov 0   ;;  %s572_s0 = inlined_call_operand.vmem [shape: bf16[32,64], index: 0, kind: input, shape index: {}]   ;;  %s573_s3 = inlined_call_operand.vmem [shape: bf16[64,256], index: 3, kind: input, shape index: {}]   ;;  %s574_s1 = inlined_call_operand.vmem [shape: f32[1,64], index: 1, kind: input, shape index: {}]   ;;  %s575_s2 = inlined_call_operand.vmem [shape: f32[1,64], index: 2, kind: input, shape index: {}]   ;;  %s576_s4 = inlined_call_operand.vmem [shape: f32[1,256], index: 4, kind: input, shape index: {}]   ;;  %s577_s5 = inlined_call_operand.vmem [shape: bf16[32,256], index: 5, kind: output, shape index: {}]  }
   0x1   :  { %v351_v0 = vld [vmem:[%s572_s0] sm:$0xff]   ;;  %v358_v1 = vld [vmem:[%s572_s0 + $0x8] sm:$0xff]   ;;  %v371_v32 = vld [vmem:[%s573_s3 + $0x14] ss:$8 sps:$4 sm:$0xff]   ;;  %205 = vmatprep.mubr.bf16.mxu0 %v404_v38  ;;  %215 = vmatprep.mubr.bf16.mxu1 %v404_v38 }
   0x2   :  { %v352_v2 = vunpack.c.l.bf16 %v351_v0  ;;  %v356_v3 = vunpack.c.l.bf16 %v358_v1  ;;  %v353_v4 = vunpack.c.h.bf16 %v351_v0  ;;  %v357_v5 = vunpack.c.h.bf16 %v358_v1  ;;  %v368_v30 = vld [vmem:[%s573_s3 + $0x4] ss:$8 sps:$4 sm:$0xff]   ;;  %v370_v31 = vld [vmem:[%s573_s3] ss:$8 sps:$4 sm:$0xff]   ;;  %v373_v33 = vld [vmem:[%s573_s3 + $0x10] ss:$8 sps:$4 sm:$0xff]  }
   0x3   :  { %173 = vmatprep.subr.bf16.mxu0 %v368_v30  ;;  %359 = vmatprep.subr.bf16.mxu1 %v368_v30  ;;  %v374_v34 = vld [vmem:[%s573_s3 + $0x24] ss:$8 sps:$4 sm:$0xff]   ;;  %v376_v35 = vld [vmem:[%s573_s3 + $0x20] ss:$8 sps:$4 sm:$0xff]   ;;  %v377_v36 = vld [vmem:[%s573_s3 + $0x34] ss:$8 sps:$4 sm:$0xff]  }
   0x4   :  { %v30_v6 = vsel %vm29_vm0, %v352_v2, 0.0  ;;  %v36_v7 = vsel %vm29_vm0, %v356_v3, 0.0  ;;  %v33_v8 = vsel %vm29_vm0, %v353_v4, 0.0  ;;  %v39_v9 = vsel %vm29_vm0, %v357_v5, 0.0  ;;  %174 = vmatpush1.bf16.msra.mxu0 %v370_v31  ;;  %363 = vmatpush1.bf16.msra.mxu1 %v370_v31  ;;  %v379_v37 = vld [vmem:[%s573_s3 + $0x30] ss:$8 sps:$4 sm:$0xff]  }
   0x5   :  { %31 = vadd.xlane.f32.xlu0 %v30_v6  ;;  %37 = vadd.xlane.f32.xlu1 %v36_v7  ;;  %v330_v53 = vld [vmem:[%s574_s1] ss:$0 sm:$0xff]  ;;  %v117_v7 = vlaneseq }
   0x6   :  { %175 = vmatprep.subr.bf16.mxu0 %v371_v32  ;;  %360 = vmatprep.subr.bf16.mxu1 %v371_v32  ;;  %v331_v59 = vld [vmem:[%s575_s2] ss:$0 sm:$0xff] }
   0x8   :  { %176 = vmatpush1.bf16.msra.mxu0 %v373_v33  ;;  %364 = vmatpush1.bf16.msra.mxu1 %v373_v33 }
   0x9   :  { %34 = vadd.xlane.f32.xlu0 %v33_v8  ;;  %40 = vadd.xlane.f32.xlu1 %v39_v9  ;;  %v118_v8 = vshrl.u32 %v117_v7, 7 }
   0xa   :  { %177 = vmatprep.subr.bf16.mxu0 %v374_v34  ;;  %361 = vmatprep.subr.bf16.mxu1 %v374_v34 }
   0xb   :  { %v119_v9 = vsub.s32 0, %v118_v8 }
   0xc   :  { %178 = vmatpush1.bf16.msra.mxu0 %v376_v35  ;;  %365 = vmatpush1.bf16.msra.mxu1 %v376_v35 }
   0xd   :  { %179 = vmatprep.subr.bf16.mxu0 %v377_v36  ;;  %362 = vmatprep.subr.bf16.mxu1 %v377_v36 }
  0x10   :  { %180 = vmatpush1.bf16.msra.mxu0 %v379_v37  ;;  %366 = vmatpush1.bf16.msra.mxu1 %v379_v37 }
  0x92   :  { %v32_v10 = vpop.xlane.xlu0 %31  ;;  %v38_v11 = vpop.xlane.xlu1 %37 }
  0x93   :  { %v43_v12 = vmul.f32 0.015625, %v32_v10  ;;  %v45_v13 = vmul.f32 0.015625, %v38_v11  ;;  %v115_v10 = vld [vmem:[%s576_s4] sm:$0x3]  ;;  %v123_v11 = vsub.s32 1, %v118_v8 }
  0x95   :  { %v445_v14 = vsub.f32 %v352_v2, %v43_v12  ;;  %v447_v15 = vsub.f32 %v356_v3, %v45_v13  ;;  %v120_v12 = vrot.slane %v115_v10, %v119_v9  ;;  %v124_v13 = vrot.slane %v115_v10, %v123_v11 }
  0x96   :  { %v35_v16 = vpop.xlane.xlu0 %34  ;;  %v41_v17 = vpop.xlane.xlu1 %40 }
  0x97   :  { %v44_v18 = vmul.f32 0.015625, %v35_v16  ;;  %v46_v19 = vmul.f32 0.015625, %v41_v17  ;;  %v51_v20 = vmul.f32 %v445_v14, %v445_v14  ;;  %v53_v21 = vmul.f32 %v447_v15, %v447_v15 }
  0x99   :  { %v453_v22 = vsub.f32 %v353_v4, %v44_v18  ;;  %v455_v23 = vsub.f32 %v357_v5, %v46_v19  ;;  %v55_v24 = vsel %vm29_vm0, %v51_v20, 0.0  ;;  %v61_v25 = vsel %vm29_vm0, %v53_v21, 0.0 }
  0x9a   :  { %56 = vadd.xlane.f32.xlu0 %v55_v24 }
  0x9b   :  { %v52_v26 = vmul.f32 %v453_v22, %v453_v22  ;;  %v54_v27 = vmul.f32 %v455_v23, %v455_v23 }
  0x9d   :  { %v58_v28 = vsel %vm29_vm0, %v52_v26, 0.0  ;;  %v64_v29 = vsel %vm29_vm0, %v54_v27, 0.0 }
  0x9e   :  { %62 = vadd.xlane.f32.xlu0 %v61_v25  ;;  %59 = vadd.xlane.f32.xlu1 %v58_v28 }
  0xa2   :  { %65 = vadd.xlane.f32.xlu1 %v64_v29 }
 0x127   :  { %v57_v39 = vpop.xlane.xlu0 %56 }
 0x128   :  { %v67_v40 = vmul.f32 0.015625, %v57_v39 }
 0x12a   :  { %v71_v41 = vadd.f32 1e-05, %v67_v40 }
 0x12b   :  { %v60_v42 = vpop.xlane.xlu1 %59  ;;  %v63_v43 = vpop.xlane.xlu0 %62 }
 0x12c   :  { %380 = vrsqrt.f32 %v71_v41  ;;  %v68_v44 = vmul.f32 0.015625, %v60_v42  ;;  %v69_v45 = vmul.f32 0.015625, %v63_v43 }
 0x12e   :  { %v72_v46 = vadd.f32 1e-05, %v68_v44  ;;  %v73_v47 = vadd.f32 1e-05, %v69_v45 }
 0x12f   :  { %v66_v48 = vpop.xlane.xlu1 %65 }
 0x130   :  { %382 = vrsqrt.f32 %v72_v46  ;;  %v70_v49 = vmul.f32 0.015625, %v66_v48 }
 0x131   :  { %384 = vrsqrt.f32 %v73_v47 }
 0x132   :  { %v74_v50 = vadd.f32 1e-05, %v70_v49 }
 0x134   :  { %386 = vrsqrt.f32 %v74_v50 }
 0x136   :  { %v381_v51 = vpop.eup %380 }
 0x137   :  { %v79_v52 = vmul.f32 %v381_v51, %v445_v14 }
 0x139   :  { %v90_v57 = vmul.f32 %v330_v53, %v79_v52 }
 0x13a   :  { %v383_v54 = vpop.eup %382 }
 0x13b   :  { %v385_v55 = vpop.eup %384  ;;  %v80_v56 = vmul.f32 %v383_v54, %v453_v22  ;;  %v101_v63 = vadd.f32 %v331_v59, %v90_v57 }
 0x13c   :  { %v81_v58 = vmul.f32 %v385_v55, %v447_v15 }
 0x13d   :  { %v91_v60 = vmul.f32 %v330_v53, %v80_v56 }
 0x13e   :  { %v387_v61 = vpop.eup %386  ;;  %v92_v1 = vmul.f32 %v330_v53, %v81_v58 }
 0x13f   :  { %v82_v62 = vmul.f32 %v387_v61, %v455_v23  ;;  %v102_v0 = vadd.f32 %v331_v59, %v91_v60 }
 0x140   :  { %v103_v4 = vadd.f32 %v331_v59, %v92_v1 }
 0x141   :  { %v105_v2 = vpack.c.bf16 %v102_v0, %v101_v63  ;;  %v93_v3 = vmul.f32 %v330_v53, %v82_v62 }
 0x143   :  { %340 = vmatmul.mubr.msk.bf16.vlgmr.msra.gmra.mrb[0].mxu0 %vm29_vm0, %v105_v2  ;;  %v104_v5 = vadd.f32 %v331_v59, %v93_v3 }
 0x145   :  { %v106_v6 = vpack.c.bf16 %v104_v5, %v103_v4 }
 0x147   :  { %341 = vmatmul.mubr.msk.bf16.vlgmr.msra.gmra.mrb[0].mxu1 %vm29_vm0, %v106_v6 }
 0x216   :  { %v207_v14 = vpop.f32.mrb[0].mxu0 }
 0x217   :  { %v504_v15 = vadd.f32 %v207_v14, %v120_v12  ;;  %v209_v16 = vpop.f32.mrb[1].mxu0 }
 0x218   :  { %v506_v17 = vadd.f32 %v209_v16, %v124_v13  ;;  %v211_v18 = vpop.f32.mrb[2].mxu0 }
 0x219   :  { %v234_v19 = vmul.f32 0.044715, %v504_v15  ;;  %v509_v20 = vadd.f32 %v211_v18, %v120_v12  ;;  %v213_v21 = vpop.f32.mrb[3].mxu0  ;;  %v226_v8 = vmul.f32 0.5, %v504_v15 }
 0x21a   :  { %v235_v22 = vmul.f32 0.044715, %v506_v17  ;;  %v512_v23 = vadd.f32 %v213_v21, %v124_v13  ;;  %v217_v24 = vpop.f32.mrb[0].mxu1  ;;  %v227_v11 = vmul.f32 0.5, %v506_v17 }
 0x21b   :  { %v242_v25 = vmul.f32 %v234_v19, %v504_v15  ;;  %v236_v26 = vmul.f32 0.044715, %v509_v20  ;;  %v516_v27 = vadd.f32 %v217_v24, %v120_v12  ;;  %v219_v28 = vpop.f32.mrb[1].mxu1  ;;  %v228_v16 = vmul.f32 0.5, %v509_v20 }
 0x21c   :  { %v243_v29 = vmul.f32 %v235_v22, %v506_v17  ;;  %v237_v30 = vmul.f32 0.044715, %v512_v23  ;;  %v520_v31 = vadd.f32 %v219_v28, %v124_v13  ;;  %v221_v32 = vpop.f32.mrb[2].mxu1  ;;  %v229_v22 = vmul.f32 0.5, %v512_v23 }
 0x21d   :  { %v250_v33 = vmul.f32 %v242_v25, %v504_v15  ;;  %v244_v34 = vmul.f32 %v236_v26, %v509_v20  ;;  %v238_v35 = vmul.f32 0.044715, %v516_v27  ;;  %v223_v36 = vpop.f32.mrb[3].mxu1  ;;  %v531_v43 = vadd.f32 %v221_v32, %v120_v12 }
 0x21e   :  { %v251_v37 = vmul.f32 %v243_v29, %v506_v17  ;;  %v245_v38 = vmul.f32 %v237_v30, %v512_v23  ;;  %v239_v39 = vmul.f32 0.044715, %v520_v31  ;;  %v538_v50 = vadd.f32 %v223_v36, %v124_v13 }
 0x21f   :  { %v258_v40 = vadd.f32 %v250_v33, %v504_v15  ;;  %v252_v41 = vmul.f32 %v244_v34, %v509_v20  ;;  %v246_v42 = vmul.f32 %v238_v35, %v516_v27  ;;  %v240_v54 = vmul.f32 0.044715, %v531_v43 }
 0x220   :  { %v259_v44 = vadd.f32 %v251_v37, %v506_v17  ;;  %v253_v45 = vmul.f32 %v245_v38, %v512_v23  ;;  %v247_v46 = vmul.f32 %v239_v39, %v520_v31  ;;  %v241_v61 = vmul.f32 0.044715, %v538_v50 }
 0x221   :  { %v266_v47 = vmul.f32 0.7978846, %v258_v40  ;;  %v260_v48 = vadd.f32 %v252_v41, %v509_v20  ;;  %v254_v49 = vmul.f32 %v246_v42, %v516_v27  ;;  %v248_v59 = vmul.f32 %v240_v54, %v531_v43 }
 0x222   :  { %v267_v51 = vmul.f32 0.7978846, %v259_v44  ;;  %v261_v52 = vadd.f32 %v253_v45, %v512_v23  ;;  %v255_v53 = vmul.f32 %v247_v46, %v520_v31  ;;  %v249_v0 = vmul.f32 %v241_v61, %v538_v50 }
 0x223   :  { %388 = vtanh.f32 %v266_v47  ;;  %v268_v55 = vmul.f32 0.7978846, %v260_v48  ;;  %v262_v56 = vadd.f32 %v254_v49, %v516_v27  ;;  %v256_v63 = vmul.f32 %v248_v59, %v531_v43 }
 0x224   :  { %390 = vtanh.f32 %v267_v51  ;;  %v269_v57 = vmul.f32 0.7978846, %v261_v52  ;;  %v263_v58 = vadd.f32 %v255_v53, %v520_v31  ;;  %v257_v2 = vmul.f32 %v249_v0, %v538_v50 }
 0x225   :  { %392 = vtanh.f32 %v268_v55  ;;  %v270_v60 = vmul.f32 0.7978846, %v262_v56  ;;  %v264_v1 = vadd.f32 %v256_v63, %v531_v43  ;;  %v230_v15 = vmul.f32 0.5, %v516_v27 }
 0x226   :  { %394 = vtanh.f32 %v269_v57  ;;  %v271_v62 = vmul.f32 0.7978846, %v263_v58  ;;  %v265_v4 = vadd.f32 %v257_v2, %v538_v50  ;;  %v231_v17 = vmul.f32 0.5, %v520_v31 }
 0x227   :  { %396 = vtanh.f32 %v270_v60  ;;  %v272_v3 = vmul.f32 0.7978846, %v264_v1  ;;  %v232_v36 = vmul.f32 0.5, %v531_v43  ;;  %v233_v38 = vmul.f32 0.5, %v538_v50 }
 0x228   :  { %398 = vtanh.f32 %v271_v62  ;;  %v273_v6 = vmul.f32 0.7978846, %v265_v4 }
 0x229   :  { %400 = vtanh.f32 %v272_v3 }
 0x22a   :  { %402 = vtanh.f32 %v273_v6 }
 0x22d   :  { %v389_v5 = vpop.eup %388 }
 0x22e   :  { %v391_v7 = vpop.eup %390  ;;  %v282_v9 = vadd.f32 1.0, %v389_v5 }
 0x22f   :  { %v393_v10 = vpop.eup %392  ;;  %v283_v12 = vadd.f32 1.0, %v391_v7 }
 0x230   :  { %v395_v13 = vpop.eup %394  ;;  %v290_v14 = vmul.f32 %v282_v9, %v226_v8  ;;  %v284_v18 = vadd.f32 1.0, %v393_v10 }
 0x231   :  { %v397_v19 = vpop.eup %396  ;;  %v291_v21 = vmul.f32 %v283_v12, %v227_v11  ;;  %v285_v24 = vadd.f32 1.0, %v395_v13 }
 0x232   :  { %v399_v25 = vpop.eup %398  ;;  %v292_v26 = vmul.f32 %v284_v18, %v228_v16  ;;  %v286_v28 = vadd.f32 1.0, %v397_v19 }
 0x233   :  { %v346_v29 = vpack.c.bf16 %v291_v21, %v290_v14  ;;  %v293_v30 = vmul.f32 %v285_v24, %v229_v22  ;;  %v287_v32 = vadd.f32 1.0, %v399_v25  ;;  %v401_v35 = vpop.eup %400 }
 0x234   :  { %v294_v33 = vmul.f32 %v286_v28, %v230_v15  ;;  %v288_v27 = vadd.f32 1.0, %v401_v35  ;;  %v403_v37 = vpop.eup %402 }
 0x235   :  { %322 = vst [vmem:[%s577_s5] sm:$0xff] %v346_v29  ;;  %v347_v20 = vpack.c.bf16 %v293_v30, %v292_v26  ;;  %v295_v34 = vmul.f32 %v287_v32, %v231_v17  ;;  %v289_v39 = vadd.f32 1.0, %v403_v37 }
 0x236   :  { %v296_v31 = vmul.f32 %v288_v27, %v232_v36 }
 0x237   :  { %323 = vst [vmem:[%s577_s5 + $0x8] sm:$0xff] %v347_v20  ;;  %v348_v23 = vpack.c.bf16 %v295_v34, %v294_v33  ;;  %v297_v40 = vmul.f32 %v289_v39, %v233_v38 }
 0x239   :  { %324 = vst [vmem:[%s577_s5 + $0x10] sm:$0xff] %v348_v23  ;;  %v349_v41 = vpack.c.bf16 %v297_v40, %v296_v31 }
 0x23b   :  { %325 = vst [vmem:[%s577_s5 + $0x18] sm:$0xff] %v349_v41 }

// kernel: croma_forward.15
= control target key start
LH: loop header
LB: loop body
LE: loop exit
PB: predicated region body
PF: predicated region fallthrough
CT: control target
= control target key end

     0   :  { %vm22_vm0 = vcmask 523264   ;;  %v401_v20 = vmov 0.0   ;;  %vm287_vm1 = vcmask 519168   ;;  %s516_s1 = inlined_call_operand.vmem [shape: bf16[256,64], index: 1, kind: input, shape index: {}]   ;;  %s517_s0 = inlined_call_operand.vmem [shape: bf16[32,256], index: 0, kind: input, shape index: {}]   ;;  %s518_s3 = inlined_call_operand.vmem [shape: bf16[32,64], index: 3, kind: input, shape index: {}]   ;;  %s519_s2 = inlined_call_operand.vmem [shape: f32[1,64], index: 2, kind: input, shape index: {}]   ;;  %s520_s4 = inlined_call_operand.vmem [shape: bf16[32,64], index: 4, kind: output, shape index: {}]  }
   0x1   :  { %v379_v0 = vld [vmem:[%s516_s1 + $0x40] sm:$0xff]   ;;  %v381_v2 = vld [vmem:[%s516_s1 + $0x48] sm:$0xff]   ;;  %v383_v4 = vld [vmem:[%s516_s1 + $0x50] sm:$0xff]   ;;  %23 = vst.msk [vmem:[#allocation2] sm:$0xff] %vm22_vm0, %v401_v20 }
   0x2   :  { %v380_v1 = vld [vmem:[%s516_s1] sm:$0xff]   ;;  %334 = vmatprep.subr.bf16.mxu0 %v379_v0  ;;  %362 = vmatprep.subr.bf16.mxu1 %v379_v0  ;;  %v382_v3 = vld [vmem:[%s516_s1 + $0x8] sm:$0xff]   ;;  %v384_v5 = vld [vmem:[%s516_s1 + $0x10] sm:$0xff]   ;;  %24 = vst.msk [vmem:[#allocation2 + $0x8] sm:$0xff] %vm22_vm0, %v401_v20 }
   0x3   :  { %335 = vmatpush3.bf16.msra.mxu0 %v380_v1  ;;  %370 = vmatpush3.bf16.msra.mxu1 %v380_v1  ;;  %v385_v6 = vld [vmem:[%s516_s1 + $0x58] sm:$0xff]   ;;  %v387_v8 = vld [vmem:[%s516_s1 + $0x60] sm:$0xff]   ;;  %v389_v10 = vld [vmem:[%s516_s1 + $0x68] sm:$0xff]   ;;  %25 = vst.msk [vmem:[#allocation2 + $0x10] sm:$0xff] %vm22_vm0, %v401_v20 }
   0x4   :  { %336 = vmatprep.subr.bf16.mxu0 %v381_v2  ;;  %363 = vmatprep.subr.bf16.mxu1 %v381_v2  ;;  %v386_v7 = vld [vmem:[%s516_s1 + $0x18] sm:$0xff]   ;;  %v388_v9 = vld [vmem:[%s516_s1 + $0x20] sm:$0xff]   ;;  %v390_v13 = vld [vmem:[%s516_s1 + $0x28] sm:$0xff]   ;;  %26 = vst.msk [vmem:[#allocation2 + $0x18] sm:$0xff] %vm22_vm0, %v401_v20 }
   0x5   :  { %v397_v11 = vld [vmem:[%s517_s0 + $0x4] ss:$8 sps:$4 sm:$0xff]   ;;  %v400_v12 = vld [vmem:[%s517_s0 + $0x14] ss:$8 sps:$4 sm:$0xff]   ;;  %v395_v18 = vld [vmem:[%s517_s0] ss:$8 sps:$4 sm:$0xff]  }
   0x6   :  { %v391_v14 = vld [vmem:[%s516_s1 + $0x70] sm:$0xff]   ;;  %215 = vmatprep.mubr.bf16.mxu0 %v397_v11  ;;  %223 = vmatprep.mubr.bf16.mxu1 %v400_v12  ;;  %v393_v16 = vld [vmem:[%s516_s1 + $0x78] sm:$0xff]   ;;  %v326_v41 = vld [vmem:[%s518_s3] sm:$0xff]  }
   0x7   :  { %337 = vmatpush3.bf16.msra.mxu0 %v382_v3  ;;  %371 = vmatpush3.bf16.msra.mxu1 %v382_v3  ;;  %v392_v15 = vld [vmem:[%s516_s1 + $0x30] sm:$0xff]   ;;  %v394_v17 = vld [vmem:[%s516_s1 + $0x38] sm:$0xff]   ;;  %v333_v42 = vld [vmem:[%s518_s3 + $0x8] sm:$0xff]   ;;  %v327_v44 = vunpack.c.l.bf16 %v326_v41  ;;  %v328_v50 = vunpack.c.h.bf16 %v326_v41 }
   0x8   :  { %338 = vmatprep.subr.bf16.mxu0 %v383_v4  ;;  %364 = vmatprep.subr.bf16.mxu1 %v383_v4  ;;  %v398_v19 = vld [vmem:[%s517_s0 + $0x10] ss:$8 sps:$4 sm:$0xff]   ;;  %v27_v23 = vld [vmem:[#allocation2] sm:$0xff]  ;;  %v331_v45 = vunpack.c.l.bf16 %v333_v42  ;;  %v332_v51 = vunpack.c.h.bf16 %v333_v42 }
   0x9   :  { %v28_v31 = vld [vmem:[#allocation2 + $0x8] sm:$0xff]  ;;  %v316_v43 = vld [vmem:[%s519_s2] ss:$0 sm:$0xff] }
   0xa   :  { %v29_v25 = vld [vmem:[#allocation2 + $0x10] sm:$0xff] }
   0xb   :  { %339 = vmatpush3.bf16.msra.mxu0 %v384_v5  ;;  %372 = vmatpush3.bf16.msra.mxu1 %v384_v5  ;;  %v30_v33 = vld [vmem:[#allocation2 + $0x18] sm:$0xff] }
   0xc   :  { %340 = vmatprep.subr.bf16.mxu0 %v385_v6  ;;  %365 = vmatprep.subr.bf16.mxu1 %v385_v6 }
   0xf   :  { %341 = vmatpush3.bf16.msra.mxu0 %v386_v7  ;;  %373 = vmatpush3.bf16.msra.mxu1 %v386_v7 }
  0x10   :  { %342 = vmatprep.subr.bf16.mxu0 %v387_v8  ;;  %366 = vmatprep.subr.bf16.mxu1 %v387_v8 }
  0x13   :  { %343 = vmatpush3.bf16.msra.mxu0 %v388_v9  ;;  %374 = vmatpush3.bf16.msra.mxu1 %v388_v9 }
  0x14   :  { %344 = vmatprep.subr.bf16.mxu0 %v389_v10  ;;  %367 = vmatprep.subr.bf16.mxu1 %v389_v10 }
  0x17   :  { %345 = vmatpush3.bf16.msra.mxu0 %v390_v13  ;;  %375 = vmatpush3.bf16.msra.mxu1 %v390_v13 }
  0x18   :  { %346 = vmatprep.subr.bf16.mxu0 %v391_v14  ;;  %368 = vmatprep.subr.bf16.mxu1 %v391_v14 }
  0x1b   :  { %347 = vmatpush3.bf16.msra.mxu0 %v392_v15  ;;  %376 = vmatpush3.bf16.msra.mxu1 %v392_v15 }
  0x1c   :  { %348 = vmatprep.subr.bf16.mxu0 %v393_v16  ;;  %369 = vmatprep.subr.bf16.mxu1 %v393_v16 }
  0x1f   :  { %349 = vmatpush3.bf16.msra.mxu0 %v394_v17  ;;  %377 = vmatpush3.bf16.msra.mxu1 %v394_v17 }
  0x22   :  { %216 = vmatmul.mubr.bf16.vlgmr.msra.gmra.mrb[0].mxu0 %v395_v18  ;;  %224 = vmatmul.mubr.bf16.vlgmr.msra.gmra.mrb[0].mxu1 %v398_v19 }
  0xf5   :  { %v350_v21 = vpop.f32.mrb[0].mxu0  ;;  %v356_v22 = vpop.f32.mrb[0].mxu1 }
  0xf6   :  { %v351_v24 = vpop.f32.mrb[1].mxu0  ;;  %v357_v26 = vpop.f32.mrb[1].mxu1 }
  0xf7   :  { %v352_v27 = vadd.f32 %v351_v24, %v350_v21  ;;  %v358_v28 = vadd.f32 %v357_v26, %v356_v22  ;;  %v353_v29 = vpop.f32.mrb[2].mxu0  ;;  %v359_v30 = vpop.f32.mrb[2].mxu1 }
  0xf8   :  { %v354_v32 = vpop.f32.mrb[3].mxu0  ;;  %v360_v34 = vpop.f32.mrb[3].mxu1 }
  0xf9   :  { %v232_v35 = vadd.f32 %v352_v27, %v27_v23  ;;  %v234_v36 = vadd.f32 %v358_v28, %v29_v25  ;;  %v355_v37 = vadd.f32 %v354_v32, %v353_v29  ;;  %v361_v38 = vadd.f32 %v360_v34, %v359_v30 }
  0xfb   :  { %237 = vst.msk [vmem:[#allocation2] sm:$0xff] %vm22_vm0, %v232_v35  ;;  %239 = vst.msk [vmem:[#allocation2 + $0x10] sm:$0xff] %vm22_vm0, %v234_v36  ;;  %v233_v39 = vadd.f32 %v355_v37, %v28_v31  ;;  %v235_v40 = vadd.f32 %v361_v38, %v30_v33 }
  0xfd   :  { %238 = vst.msk [vmem:[#allocation2 + $0x8] sm:$0xff] %vm22_vm0, %v233_v39  ;;  %240 = vst.msk [vmem:[#allocation2 + $0x18] sm:$0xff] %vm22_vm0, %v235_v40 }
 0x102   :  { %v244_v46 = vld [vmem:[#allocation2] sm:$0xff]  ;;  %v246_v47 = vld [vmem:[#allocation2 + $0x10] sm:$0xff] }
 0x103   :  { %v255_v48 = vadd.f32 %v316_v43, %v244_v46  ;;  %v257_v49 = vadd.f32 %v316_v43, %v246_v47 }
 0x104   :  { %v245_v52 = vld [vmem:[#allocation2 + $0x8] sm:$0xff]  ;;  %v247_v53 = vld [vmem:[#allocation2 + $0x18] sm:$0xff] }
 0x105   :  { %v267_v54 = vadd.f32 %v327_v44, %v255_v48  ;;  %v269_v55 = vadd.f32 %v331_v45, %v257_v49  ;;  %v256_v56 = vadd.f32 %v316_v43, %v245_v52  ;;  %v258_v57 = vadd.f32 %v316_v43, %v247_v53 }
 0x107   :  { %v321_v58 = vpack.c.bf16 %v267_v54, %v267_v54  ;;  %v323_v59 = vpack.c.bf16 %v269_v55, %v269_v55  ;;  %v268_v60 = vadd.f32 %v328_v50, %v256_v56  ;;  %v270_v61 = vadd.f32 %v332_v51, %v258_v57 }
 0x109   :  { %288 = vst.msk [vmem:[%s520_s4] sm:$0xf] %vm287_vm1, %v321_v58  ;;  %290 = vst.msk [vmem:[%s520_s4 + $0x8] sm:$0xf] %vm287_vm1, %v323_v59  ;;  %v322_v62 = vpack.c.bf16 %v268_v60, %v268_v60  ;;  %v324_v63 = vpack.c.bf16 %v270_v61, %v270_v61 }
 0x10b   :  { %289 = vst.msk [vmem:[%s520_s4 + $0x4] sm:$0xf] %vm287_vm1, %v322_v62  ;;  %291 = vst.msk [vmem:[%s520_s4 + $0xc] sm:$0xf] %vm287_vm1, %v324_v63 }

// kernel: croma_forward.20
= control target key start
LH: loop header
LB: loop body
LE: loop exit
PB: predicated region body
PF: predicated region fallthrough
CT: control target
= control target key end

     0   :  { %s670_s24 = smov 0   ;;  %s739_s0 = inlined_call_operand.vmem [shape: bf16[2,16,64], index: 0, kind: input, shape index: {}]   ;;  %s740_s1 = inlined_call_operand.vmem [shape: f32[1,64], index: 1, kind: input, shape index: {}]   ;;  %s741_s2 = inlined_call_operand.vmem [shape: f32[1,64], index: 2, kind: input, shape index: {}]   ;;  %s742_s3 = inlined_call_operand.vmem [shape: f32[1,64], index: 3, kind: input, shape index: {}]   ;;  %s743_s4 = inlined_call_operand.vmem [shape: f32[1,64], index: 4, kind: input, shape index: {}]   ;;  %s744_s5 = inlined_call_operand.vmem [shape: bf16[64,256], index: 5, kind: input, shape index: {}]   ;;  %s745_s6 = inlined_call_operand.vmem [shape: f32[1,256], index: 6, kind: input, shape index: {}]   ;;  %s746_s7 = inlined_call_operand.vmem [shape: bf16[2,1,256], index: 7, kind: output, shape index: {}]  }
   0x1 LB: > { %s561_s25 = sadd.s32 4294967295, %s626_s24   ;;  %p565_p0 = scmp.ge.s32.totalorder %s626_s24, 1  ;;  %s626_s24 = sphi %s670_s24, %s17_s24  }
   0x2   : > { %p237_p1 = scmp.lt.s32.totalorder %s626_s24, 3 }
   0x4   : > { %p238_p2 = pnand %p565_p0, %p237_p1 }
   0x5   : > { %p268_p3 = scmp.lt.s32.totalorder (!%p238_p2), %s561_s25, 1  ;;  %vm282_vm0 = vcmask (!%p238_p2), 523264   ;;  %v569_v22 = vld [vmem:[%s740_s1] ss:$0 sm:$0xff] (!%p238_p2)  ;;  %v598_v47 = vld [vmem:[%s744_s5 + $0x4] ss:$8 sps:$4 sm:$0xff] (!%p238_p2)  }
   0x6   : > { %241 = sbr.rel (%p238_p2) target bundleno = 916 (0x394), region = 48  ;;  %v570_v26 = vld [vmem:[%s741_s2] ss:$0 sm:$0xff] (!%p238_p2)  ;;  %419 = vmatprep.subr.bf16.mxu0 (!%p238_p2), %v598_v47  ;;  %v601_v49 = vld [vmem:[%s744_s5 + $0x14] ss:$8 sps:$4 sm:$0xff] (!%p238_p2)   ;;  %v628_v55 = vmov (!%p238_p2), 0  }
   0x7   : > { %v600_v48 = vld [vmem:[%s744_s5] ss:$8 sps:$4 sm:$0xff] (!%p238_p2)   ;;  %v603_v50 = vld [vmem:[%s744_s5 + $0x10] ss:$8 sps:$4 sm:$0xff] (!%p238_p2)   ;;  %v604_v51 = vld [vmem:[%s744_s5 + $0x24] ss:$8 sps:$4 sm:$0xff] (!%p238_p2)   ;;  %451 = vmatprep.mubr.bf16.mxu0 (!%p238_p2), %v628_v55 }
   0x8   : > { %420 = vmatpush1.bf16.msra.mxu0 (!%p238_p2), %v600_v48  ;;  %v606_v52 = vld [vmem:[%s744_s5 + $0x20] ss:$8 sps:$4 sm:$0xff] (!%p238_p2)   ;;  %v607_v53 = vld [vmem:[%s744_s5 + $0x34] ss:$8 sps:$4 sm:$0xff] (!%p238_p2)   ;;  %v609_v54 = vld [vmem:[%s744_s5 + $0x30] ss:$8 sps:$4 sm:$0xff] (!%p238_p2)  }
   0x9   : > { %421 = vmatprep.subr.bf16.mxu0 (!%p238_p2), %v601_v49  ;;  %v351_v60 = vld [vmem:[%s742_s3] sm:$0x1] (!%p238_p2)  ;;  %vm498_vm1 = vcmask (!%p238_p2), 1040384   ;;  %vm499_vm2 = vsmask.f32 (!%p238_p2), 256  ;;  %vm501_vm3 = vcmask (!%p238_p2), 1041409  }
   0xa   : > { %v353_v62 = vld [vmem:[%s743_s4] sm:$0x1] (!%p238_p2)  ;;  %vm502_vm4 = vsmask.f32 (!%p238_p2), 1280  ;;  %vm500_vm5 = vmand (!%p238_p2), %vm498_vm1, %vm499_vm2 }
   0xb   : > { %vm503_vm6 = vmand (!%p238_p2), %vm501_vm3, %vm502_vm4 }
   0xc   : > { %422 = vmatpush1.bf16.msra.mxu0 (!%p238_p2), %v603_v50  ;;  %vm504_vm7 = vmor (!%p238_p2), %vm503_vm6, %vm500_vm5 }
   0xd   : > { %s748_s25 = smov (!%p268_p3, %s561_s25), 1  ;;  %423 = vmatprep.subr.bf16.mxu0 %v604_v51 }
   0xe   : > { %s583_s26 = sshll.u32 %s748_s25, 3  ;;  %s568_s12 = sshll.u32 %s748_s25, 1 }
   0xf   : > { %s272_s29 = scalar_lea.vmem %s739_s0, %s583_s26  ;;  %s276_s15 = scalar_lea.vmem %s746_s7, %s568_s12 }
  0x10   : > { %v585_v0 = vld [vmem:[%s272_s29] sm:$0xff]   ;;  %424 = vmatpush1.bf16.msra.mxu0 %v606_v52 }
  0x11   : > { %v586_v1 = vunpack.c.l.bf16 %v585_v0  ;;  %v587_v2 = vunpack.c.h.bf16 %v585_v0  ;;  %425 = vmatprep.subr.bf16.mxu0 %v607_v53 }
  0x13   : > { %v283_v3 = vsel %vm282_vm0, %v586_v1, 0.0  ;;  %v286_v4 = vsel %vm282_vm0, %v587_v2, 0.0 }
  0x14   : > { %284 = vadd.xlane.f32.xlu0 %v283_v3  ;;  %426 = vmatpush1.bf16.msra.mxu0 %v609_v54 }
  0x18   : > { %287 = vadd.xlane.f32.xlu0 %v286_v4 }
  0xa1   : > { %v285_v5 = vpop.xlane.xlu0 %284 }
  0xa2   : > { %v290_v6 = vmul.f32 0.015625, %v285_v5  ;;  %v364_v5 = vld [vmem:[%s745_s6] sm:$0x3] }
  0xa4   : > { %v292_v7 = vsub.f32 %v586_v1, %v290_v6 }
  0xa5   : > { %v288_v8 = vpop.xlane.xlu0 %287 }
  0xa6   : > { %v291_v9 = vmul.f32 0.015625, %v288_v8  ;;  %v294_v10 = vmul.f32 %v292_v7, %v292_v7 }
  0xa8   : > { %v293_v11 = vsub.f32 %v587_v2, %v291_v9  ;;  %v296_v12 = vsel %vm282_vm0, %v294_v10, 0.0  ;;  %v406_v2 = vlaneseq }
  0xa9   : > { %297 = vadd.xlane.f32.xlu1 %v296_v12 }
  0xaa   : > { %v295_v13 = vmul.f32 %v293_v11, %v293_v11  ;;  %v407_v3 = vshrl.u32 %v406_v2, 7 }
  0xac   : > { %v299_v14 = vsel %vm282_vm0, %v295_v13, 0.0  ;;  %v408_v4 = vsub.s32 0, %v407_v3  ;;  %v412_v6 = vsub.s32 1, %v407_v3 }
  0xad   : > { %300 = vadd.xlane.f32.xlu1 %v299_v14 }
  0xae   : > { %v413_v8 = vrot.slane %v364_v5, %v412_v6 }
 0x136   : > { %v298_v15 = vpop.xlane.xlu1 %297 }
 0x137   : > { %v302_v16 = vmul.f32 0.015625, %v298_v15 }
 0x139   : > { %v304_v17 = vadd.f32 1e-05, %v302_v16 }
 0x13a   : > { %v301_v18 = vpop.xlane.xlu1 %300 }
 0x13b   : > { %610 = vrsqrt.f32 %v304_v17  ;;  %v303_v19 = vmul.f32 0.015625, %v301_v18 }
 0x13d   : > { %v305_v20 = vadd.f32 1e-05, %v303_v19 }
 0x13f   : > { %612 = vrsqrt.f32 %v305_v20 }
 0x145   : > { %v611_v21 = vpop.eup %610 }
 0x146   : > { %v308_v23 = vmul.f32 %v611_v21, %v292_v7  ;;  %v409_v7 = vrot.slane %v364_v5, %v408_v4 }
 0x148   : > { %v317_v24 = vmul.f32 %v569_v22, %v308_v23 }
 0x149   : > { %v613_v25 = vpop.eup %612 }
 0x14a   : > { %v309_v27 = vmul.f32 %v613_v25, %v293_v11  ;;  %v326_v29 = vadd.f32 %v570_v26, %v317_v24  ;;  %v629_v25 = vmov 1966171168  }
 0x14c   : > { %v318_v28 = vmul.f32 %v569_v22, %v309_v27  ;;  %v328_v31 = vsel %vm282_vm0, %v326_v29, 0.0 }
 0x14e   : > { %v327_v30 = vadd.f32 %v570_v26, %v318_v28  ;;  %v484_v26 = vunpack.c.l.s4 %v629_v25 }
 0x150   : > { %v329_v32 = vsel %vm282_vm0, %v327_v30, 0.0  ;;  %v485_v28 = vunpack.c.0.s8 %v484_v26 }
 0x151   : > { %v330_v33 = vadd.f32 %v329_v32, %v328_v31 }
 0x153   : > { %v331_v34 = vrot.slane %v330_v33, 4 }
 0x155   : > { %v332_v35 = vadd.f32 %v331_v34, %v330_v33 }
 0x157   : > { %v333_v36 = vrot.slane %v332_v35, 2 }
 0x159   : > { %v334_v37 = vadd.f32 %v333_v36, %v332_v35  ;;  %v488_v35 = vsub.s32 %v485_v28, %v407_v3 }
 0x15b   : > { %v335_v38 = vrot.slane %v334_v37, 1 }
 0x15d   : > { %v336_v39 = vadd.f32 %v335_v38, %v334_v37 }
 0x15f   : > { %v337_v40 = vmul.f32 0.0625, %v336_v39  ;;  %v505_v39 = vld [vmem:[%s276_s15] sm:$0x3] }
 0x161   : > { %v338_v41 = vsel %vm282_vm0, %v337_v40, 0.0 }
 0x162   : > { %339 = vadd.xlane.f32.xlu0 %v338_v41 }
 0x1ef   : > { %v340_v42 = vpop.xlane.xlu0 %339 }
 0x1f0   : > { %v341_v43 = vmul.f32 0.015625, %v340_v42 }
 0x1f2   : > { %v342_v44 = vsub.f32 %v337_v40, %v341_v43 }
 0x1f4   : > { %v343_v45 = vmul.f32 %v342_v44, %v342_v44 }
 0x1f6   : > { %v344_v46 = vsel %vm282_vm0, %v343_v45, 0.0 }
 0x1f7   : > { %345 = vadd.xlane.f32.xlu1 %v344_v46 }
 0x284   : > { %v346_v56 = vpop.xlane.xlu1 %345 }
 0x285   : > { %v347_v57 = vmul.f32 0.015625, %v346_v56 }
 0x287   : > { %v348_v58 = vadd.f32 1e-05, %v347_v57 }
 0x289   : > { %614 = vrsqrt.f32 %v348_v58 }
 0x293   : > { %v615_v59 = vpop.eup %614 }
 0x294   : > { %v350_v61 = vmul.f32 %v615_v59, %v342_v44 }
 0x296   : > { %v352_v63 = vmul.f32 %v351_v60, %v350_v61 }
 0x298   : > { %v354_v0 = vadd.f32 %v353_v62, %v352_v63 }
 0x29a   : > { %v355_v1 = vpack.c.bf16 %v354_v0, %v354_v0 }
 0x29c   : > { %579 = vmatmul.mubr.msk.bf16.vlgmr.msra.gmra.mrb[0].mxu0 %vm282_vm0, %v355_v1 }
 0x36f   : > { %v453_v9 = vpop.f32.mrb[0].mxu0 }
 0x370   : > { %v454_v10 = vadd.f32 %v453_v9, %v409_v7  ;;  %v455_v11 = vpop.f32.mrb[1].mxu0 }
 0x371   : > { %v456_v12 = vadd.f32 %v455_v11, %v413_v8  ;;  %v457_v13 = vpop.f32.mrb[2].mxu0 }
 0x372   : > { %v462_v14 = vmul.f32 0.044715, %v454_v10  ;;  %v458_v15 = vpop.f32.mrb[3].mxu0  ;;  %v460_v30 = vmul.f32 0.5, %v454_v10 }
 0x373   : > { %v463_v16 = vmul.f32 0.044715, %v456_v12  ;;  %v461_v32 = vmul.f32 0.5, %v456_v12 }
 0x374   : > { %v464_v17 = vmul.f32 %v462_v14, %v454_v10 }
 0x375   : > { %v465_v18 = vmul.f32 %v463_v16, %v456_v12 }
 0x376   : > { %v466_v19 = vmul.f32 %v464_v17, %v454_v10 }
 0x377   : > { %v467_v20 = vmul.f32 %v465_v18, %v456_v12 }
 0x378   : > { %v468_v21 = vadd.f32 %v466_v19, %v454_v10 }
 0x379   : > { %v469_v22 = vadd.f32 %v467_v20, %v456_v12 }
 0x37a   : > { %v470_v23 = vmul.f32 0.7978846, %v468_v21 }
 0x37b   : > { %v471_v24 = vmul.f32 0.7978846, %v469_v22 }
 0x37c   : > { %616 = vtanh.f32 %v470_v23 }
 0x37d   : > { %618 = vtanh.f32 %v471_v24 }
 0x386   : > { %v617_v27 = vpop.eup %616 }
 0x387   : > { %v619_v29 = vpop.eup %618  ;;  %v474_v31 = vadd.f32 1.0, %v617_v27 }
 0x388   : > { %v475_v33 = vadd.f32 1.0, %v619_v29 }
 0x389   : > { %v476_v34 = vmul.f32 %v474_v31, %v460_v30 }
 0x38a   : > { %v477_v36 = vmul.f32 %v475_v33, %v461_v32 }
 0x38c   : > { %v580_v37 = vpack.c.bf16 %v477_v36, %v476_v34 }
 0x38e   : > { %v489_v38 = vrot.slane %v580_v37, %v488_v35 }
 0x390   : > { %v496_v40 = vrot.slane %v489_v38, %v488_v35 }
 0x392   : > { %v506_v41 = vsel %vm504_vm7, %v496_v40, %v505_v39 }
 0x393   : > { %507 = vst [vmem:[%s276_s15] sm:$0x3] %v506_v41 }
 0x394 PF: > { %s17_s24 = sadd.s32 1, %s626_s24  }
 0x395   : > { %p14_p4 = scmp.ge.s32.totalorder %s17_s24, 4  }
 0x397   :  { %16 = sbr.rel (!%p14_p4) target bundleno = 1 (0x1), region = 78 }

// kernel: croma_forward.21
= control target key start
LH: loop header
LB: loop body
LE: loop exit
PB: predicated region body
PF: predicated region fallthrough
CT: control target
= control target key end

     0   :  { %v68_v9 = vlaneseq  ;;  %v330_v13 = vmov 1966171168   ;;  %s422_s0 = inlined_call_operand.vmem [shape: bf16[2,256], index: 0, kind: input, shape index: {}]   ;;  %s423_s1 = inlined_call_operand.vmem [shape: bf16[256,64], index: 1, kind: input, shape index: {}]   ;;  %s424_s2 = inlined_call_operand.vmem [shape: f32[1,64], index: 2, kind: input, shape index: {}]   ;;  %s425_s3 = inlined_call_operand.hbm [shape: f32[2,64], index: 3, kind: output, shape index: {}]  }
   0x1   :  { %v290_v0 = vld [vmem:[%s423_s1 + $0x40] sm:$0xff]   ;;  %v292_v2 = vld [vmem:[%s423_s1 + $0x48] sm:$0xff]   ;;  %v294_v4 = vld [vmem:[%s423_s1 + $0x50] sm:$0xff]   ;;  %v66_v14 = vunpack.c.l.s4 %v330_v13 }
   0x2   :  { %v291_v1 = vld [vmem:[%s423_s1] sm:$0xff]   ;;  %265 = vmatprep.subr.bf16.mxu0 %v290_v0  ;;  %v293_v3 = vld [vmem:[%s423_s1 + $0x8] sm:$0xff]   ;;  %v295_v5 = vld [vmem:[%s423_s1 + $0x10] sm:$0xff]   ;;  %v69_v15 = vshrl.u32 %v68_v9, 7 }
   0x3   :  { %266 = vmatpush3.bf16.msra.mxu0 %v291_v1  ;;  %v296_v6 = vld [vmem:[%s423_s1 + $0x58] sm:$0xff]   ;;  %v298_v8 = vld [vmem:[%s423_s1 + $0x60] sm:$0xff]   ;;  %v300_v11 = vld [vmem:[%s423_s1 + $0x68] sm:$0xff]  }
   0x4   :  { %267 = vmatprep.subr.bf16.mxu0 %v292_v2  ;;  %v297_v7 = vld [vmem:[%s423_s1 + $0x18] sm:$0xff]   ;;  %v299_v10 = vld [vmem:[%s423_s1 + $0x20] sm:$0xff]  }
   0x5   :  { %v247_v12 = vld.sshfl [vmem:[%s422_s0] sm:$0x11 pattern:$0x75316420] }
   0x7   :  { %268 = vmatpush3.bf16.msra.mxu0 %v293_v3 }
   0x8   :  { %269 = vmatprep.subr.bf16.mxu0 %v294_v4 }
   0xb   :  { %270 = vmatpush3.bf16.msra.mxu0 %v295_v5 }
   0xc   :  { %271 = vmatprep.subr.bf16.mxu0 %v296_v6 }
   0xf   :  { %272 = vmatpush3.bf16.msra.mxu0 %v297_v7 }
  0x10   :  { %273 = vmatprep.subr.bf16.mxu0 %v298_v8 }
  0x11   :  { %8 = vsyncpa [#allocation4], 0  ;;  %v301_v16 = vld [vmem:[%s423_s1 + $0x28] sm:$0xff]   ;;  %v64_v17 = vcombine.high %v247_v12, %v247_v12  ;;  %v67_v18 = vunpack.c.0.s8 %v66_v14  ;;  %v302_v19 = vld [vmem:[%s423_s1 + $0x70] sm:$0xff]   ;;  %vm20_vm0 = vcmask 517120   ;;  %v331_v26 = vmov 0.0  }
  0x12   :  { %v303_v21 = vld [vmem:[%s423_s1 + $0x30] sm:$0xff]   ;;  %v304_v23 = vld [vmem:[%s423_s1 + $0x78] sm:$0xff]   ;;  %21 = vst.msk [vmem:[#allocation2] sm:$0x3] %vm20_vm0, %v331_v26  ;;  %v264_v34 = vld [vmem:[%s424_s2] ss:$0 sm:$0xff] }
  0x13   :  { %274 = vmatpush3.bf16.msra.mxu0 %v299_v10  ;;  %v70_v20 = vsub.s32 %v67_v18, %v69_v15  ;;  %v305_v24 = vld [vmem:[%s423_s1 + $0x38] sm:$0xff]   ;;  %s332_s1 = smov [#allocation3]  }
  0x14   :  { %275 = vmatprep.subr.bf16.mxu0 %v300_v11  ;;  %s239_s20 = sshll.u32 %s332_s1, 4  ;;  %s240_s20 = int_to_ptr.vmem [resolvable:$true] %s239_s20 }
  0x15   :  { %v78_v22 = vrot.slane %v64_v17, %v70_v20  ;;  %v71_v25 = vrot.slane %v247_v12, %v70_v20  ;;  %s306_s21 = scalar_lea.vmem %s240_s20, 32  ;;  %p311_p1 = scmp.lt.s32.totalorder %s240_s20, %s240_s20 }
  0x16   :  { %p307_p0 = scmp.ne.s32.totalorder %s240_s20, %s306_s21  ;;  %p312_p2 = scmp.lt.s32.totalorder %s306_s21, %s306_s21 }
  0x17   :  { %276 = vmatpush3.bf16.msra.mxu0 %v301_v16  ;;  %209 = vmatprep.mubr.bf16.mxu0 %v78_v22 }
  0x18   :  { %277 = vmatprep.subr.bf16.mxu0 %v302_v19  ;;  %p313_p3 = por %p312_p2, %p311_p1 }
  0x19   :  { %v22_v28 = vld [vmem:[#allocation2] sm:$0x3] }
  0x1a   :  { %p314_p4 = pnand %p313_p3, %p307_p0 }
  0x1b   :  { %278 = vmatpush3.bf16.msra.mxu0 %v303_v21 }
  0x1c   :  { %279 = vmatprep.subr.bf16.mxu0 %v304_v23 }
  0x1f   :  { %280 = vmatpush3.bf16.msra.mxu0 %v305_v24 }
  0x22   :  { %210 = vmatmul.mubr.bf16.vlgmr.msra.gmra.mrb[0].mxu0 %v71_v25 }
  0xf5   :  { %v281_v27 = vpop.f32.mrb[0].mxu0 }
  0xf6   :  { %v282_v29 = vpop.f32.mrb[1].mxu0 }
  0xf7   :  { %v283_v30 = vadd.f32 %v282_v29, %v281_v27  ;;  %v284_v31 = vpop.f32.mrb[2].mxu0 }
  0xf8   :  { %v285_v32 = vpop.f32.mrb[3].mxu0 }
  0xf9   :  { %v217_v33 = vadd.f32 %v283_v30, %v22_v28 }
  0xfb   :  { %219 = vst.msk [vmem:[#allocation2] sm:$0x3] %vm20_vm0, %v217_v33 }
 0x102   :  { %v223_v35 = vld [vmem:[#allocation2] sm:$0x3] }
 0x103   :  { %v231_v36 = vadd.f32 %v264_v34, %v223_v35 }
 0x105   :  { %232 = vst.msk [vmem:[#allocation3] sm:$0x3] %vm20_vm0, %v231_v36 }
 0x106   :  { %317 = shalt.err (!%p314_p4)
}
 0x107   :  { %s318_s24 = scalar_lea.hbm %s425_s3, 32 }
 0x108   :  { %p319_p5 = scmp.ne.s32.totalorder %s425_s3, %s318_s24  ;;  %p322_p6 = scmp.lt.u32.totalorder %s318_s24, %s425_s3 }
 0x10a   :  { %p324_p7 = pnand %p322_p6, %p319_p5 }
 0x10c   :  { %327 = shalt.err (!%p324_p7)
}
 0x10d   :  { %242 = dma.vmem_to_hbm [thread:$0]  %s240_s20, 32, %s425_s3, [#allocation4]  }
 0x10e   :  { %328 = dma.done.wait [#allocation4], 32  }
 0x10f   :  { %329 = vsyncadd [#allocation4], 4294967264 }
 0x110   :  { %246 = vsyncpa [#allocation4], 1 }

</bundles_post_ra>
